<compile_context>
chip_gen: v7x
topology: tpu7x:2x2x1
jax: 0.10.0
libtpu: 0.0.40
codegen_flags: <defaults>
</compile_context>

<pallas_src>
import jax
import jax.numpy as jnp
import numpy as np
from jax.experimental import pallas as pl
from jax.experimental.pallas import tpu as pltpu


# ----------------------------- JAX glue (index computation) -----------------------------

def knn_jax(points, k):
    """points: (B, C_p, N) -> neighbor indices (B, N, k). Same math as torch knn()."""
    inner = -2.0 * jnp.einsum("bcn,bcm->bnm", points, points)
    xx = jnp.sum(points ** 2, axis=1, keepdims=True)             # (B, 1, N)
    pairwise = -xx - inner - jnp.swapaxes(xx, 1, 2)               # (B, N, N) = -||xi-xj||^2
    _, idx = jax.lax.top_k(pairwise, k + 1)                       # includes self at position 0
    return idx[:, :, 1:]                                          # (B, N, k)


def gather_neighbors(features, idx):
    """features: (B, C, N) (already compute dtype), idx: (B, N, k)
    -> nbr (B, k, N, C) channels-last neighbor-major, f_bnc (B, N, C)."""
    B = features.shape[0]
    f_bnc = jnp.transpose(features, (0, 2, 1))                    # (B, N, C)
    idx_t = jnp.transpose(idx, (0, 2, 1))                         # (B, k, N)
    nbr = f_bnc[jnp.arange(B)[:, None, None], idx_t, :]           # (B, k, N, C)
    return nbr, f_bnc


# ----------------------------- Pallas kernel -----------------------------

def _make_kernel(num_layers, k, nt, ep_dtype):
    def kernel(*refs):
        # refs = nbr, feat,
        #        w_ctr, w_nbr, b1,                  (first layer, weight-split, BN scale folded)
        #        [w_i, b_i] * (num_layers - 1),
        #        wsc, bsc, out
        nbr_ref, feat_ref = refs[0], refs[1]
        out_ref = refs[-1]
        p = 2

        x_ctr = feat_ref[0]                                       # (nt, C_in), compute dtype
        c_in = nbr_ref.shape[-1]
        nbr2d = nbr_ref[0].reshape(k * nt, c_in)                  # free: nt % 8 == 0

        w_ctr = refs[p][...]                                      # (C_in, C1p) = (W_top - W_bot) * s1
        w_nbr = refs[p + 1][...]                                  # (C_in, C1p) =  W_bot * s1
        b1 = refs[p + 2][...]                                     # (1, C1p) folded BN shift
        p += 3
        c1 = w_nbr.shape[-1]

        # first 1x1 conv: center term computed once per point, broadcast over k neighbors
        ctr_term = jnp.dot(x_ctr, w_ctr, preferred_element_type=jnp.float32)   # (nt, C1p)
        nbr_term = jnp.dot(nbr2d, w_nbr, preferred_element_type=jnp.float32)   # (k*nt, C1p)
        x = nbr_term.reshape(k, nt, c1) + ctr_term[None, :, :]                 # f32
        x = jnp.maximum(x.astype(ep_dtype) + b1, 0.0).reshape(k * nt, c1)      # shift + ReLU

        # remaining 1x1 convs (channel matmuls, scale pre-folded) + shift + ReLU
        for _ in range(num_layers - 1):
            w = refs[p][...]
            b = refs[p + 1][...]
            p += 2
            acc = jnp.dot(x, w, preferred_element_type=jnp.float32)
            x = jnp.maximum(acc.astype(ep_dtype) + b, 0.0)

        # mean over the k neighbors (f32 accumulation)
        c_last = x.shape[-1]
        x32 = x.reshape(k, nt, c_last).astype(jnp.float32)
        fts = jnp.sum(x32, axis=0) * (1.0 / k)                                  # (nt, CLp)

        # shortcut 1x1 conv (scale folded) + shift, residual add, ReLU -- f32 epilogue
        wsc = refs[p][...]
        bsc = refs[p + 1][...]
        sc = jnp.dot(x_ctr, wsc, preferred_element_type=jnp.float32) + bsc      # (nt, CLp)
        res = jnp.maximum(sc + fts, 0.0)                                        # (nt, CLp) f32

        # channels-first, lane-dense store (Nt is a multiple of 128)
        out_ref[0] = res.T                                                      # (CLp, nt)
    return kernel


# ----------------------------- sizing helpers -----------------------------

def _round_up(x, m):
    return ((x + m - 1) // m) * m


def _pad_cols(a, mult):
    c = a.shape[-1]
    cp = _round_up(c, mult)
    if cp == c:
        return a
    return jnp.pad(a, [(0, 0)] * (a.ndim - 1) + [(0, cp - c)])


def _vmem_budget():
    """~75% of per-core VMEM: ~96 MiB on v5e/v6e, ~48 MiB on v7x; 48 MiB safe fallback."""
    cap = 64 * 1024 * 1024
    try:
        info = pltpu.get_tpu_info()
        cap = int(getattr(info, "vmem_capacity_bytes", cap)) or cap
    except Exception:
        pass
    return (cap * 3) // 4


def _choose_nt(n, k, c_in, c_max_pad, c_out_pad, bpe_in, block_budget):
    """Largest Nt (multiple of 128, capped at 1024 and at padded-N) whose VMEM estimate fits."""
    c_in_eff = max(c_in, 128)                      # minor-dim lane padding in VMEM layout

    def est(nt):
        return (2 * k * nt * c_in_eff * bpe_in     # double-buffered neighbor block
                + 2 * nt * c_in_eff * bpe_in       # double-buffered center block
                + 2 * c_out_pad * nt * 4           # double-buffered f32 output block
                + 6 * k * nt * c_max_pad * 4)      # live intermediates + margin

    cap_nt = max(128, min(_round_up(n, 128), 1024))
    nt = 128
    for cand in range(128, cap_nt + 1, 128):
        if est(cand) <= block_budget:
            nt = cand
    return nt, est(nt)


def _resident_spec(arr):
    """Grid-resident (constant block index) spec; single buffer when supported."""
    nd = arr.ndim
    idx = lambda b, n, _nd=nd: (0,) * _nd
    if hasattr(pl, "Buffered"):
        try:
            return pl.BlockSpec(arr.shape, idx, pipeline_mode=pl.Buffered(1))
        except Exception:
            pass
    return pl.BlockSpec(arr.shape, idx)


# ----------------------------- wrapper -----------------------------

def edge_conv_block(points, features, params, k, compute_dtype=jnp.float32, pad_mult=128):
    """points: (B, C_p, N), features: (B, C_in, N) -> (B, C_out, N) (PyTorch layout)."""
    B, C_in, N = features.shape
    layers = params["layers"]
    num_layers = len(layers)
    C_out = layers[-1][0].shape[1]
    ep_dtype = (jnp.float32 if jnp.dtype(compute_dtype) == jnp.dtype(jnp.float32)
                else compute_dtype)

    # --- index plumbing (plain JAX); cast BEFORE the gather so the 4D stream is compute_dtype ---
    idx = knn_jax(points, k)                                      # (B, N, k)
    feat_cd = features.astype(compute_dtype)                      # (B, C_in, N)
    nbr, f_bnc = gather_neighbors(feat_cd, idx)                   # (B, k, N, C_in), (B, N, C_in)

    # --- params: weight-split + BN-scale folding + lane padding ---
    w1, s1, b1 = layers[0]                                        # w1: (2*C_in, C1)
    w_top, w_bot = w1[:C_in], w1[C_in:]
    w_ctr = _pad_cols((w_top - w_bot) * s1, pad_mult).astype(compute_dtype)
    w_nbr = _pad_cols(w_bot * s1, pad_mult).astype(compute_dtype)
    flat = [w_ctr, w_nbr, _pad_cols(b1, pad_mult).astype(ep_dtype)]
    c_prev_pad = w_ctr.shape[1]
    for (w, s, b) in layers[1:]:
        wp = _pad_cols(w * s, pad_mult)                           # fold BN scale, pad out-channels
        wp = jnp.pad(wp, [(0, c_prev_pad - wp.shape[0]), (0, 0)]) # zero-pad input rows
        flat += [wp.astype(compute_dtype), _pad_cols(b, pad_mult).astype(ep_dtype)]
        c_prev_pad = wp.shape[1]
    C_out_pad = c_prev_pad
    flat += [_pad_cols(params["wsc"] * params["ssc"], pad_mult).astype(compute_dtype),
             _pad_cols(params["bsc"], pad_mult).astype(jnp.float32)]

    # --- generation-aware tiling: pick Nt from the per-core VMEM budget ---
    budget = _vmem_budget()
    param_bytes = sum(int(np.prod(a.shape)) * a.dtype.itemsize for a in flat)
    c_max_pad = max(int(a.shape[-1]) for a in flat)
    bpe_in = jnp.dtype(compute_dtype).itemsize
    block_budget = max(budget - 2 * param_bytes, 8 * 1024 * 1024)
    Nt, blocks_est = _choose_nt(N, k, C_in, c_max_pad, C_out_pad, bpe_in, block_budget)

    # pad N up to a multiple of Nt (processed rows are garbage, sliced off below)
    N_pad = _round_up(N, Nt)
    n_tiles = N_pad // Nt
    if N_pad != N:
        nbr = jnp.pad(nbr, ((0, 0), (0, 0), (0, N_pad - N), (0, 0)))
        f_bnc = jnp.pad(f_bnc, ((0, 0), (0, N_pad - N), (0, 0)))

    vmem_limit = int(min(max(blocks_est + 2 * param_bytes, 32 * 1024 * 1024), budget))

    in_specs = [
        pl.BlockSpec((1, k, Nt, C_in), lambda b, n: (b, 0, n, 0)),
        pl.BlockSpec((1, Nt, C_in), lambda b, n: (b, n, 0)),
    ]
    for arr in flat:
        in_specs.append(_resident_spec(arr))

    kernel = _make_kernel(num_layers, k, Nt, ep_dtype)

    out = pl.pallas_call(
        kernel,
        out_shape=jax.ShapeDtypeStruct((B, C_out_pad, N_pad), jnp.float32),
        grid=(B, n_tiles),
        in_specs=in_specs,
        out_specs=pl.BlockSpec((1, C_out_pad, Nt), lambda b, n: (b, 0, n)),
        compiler_params=pltpu.CompilerParams(
            dimension_semantics=("parallel", "parallel"),
            vmem_limit_bytes=vmem_limit),
    )(nbr, f_bnc, *flat)

    # kernel already emits channels-first; only drop channel / point padding
    return out[:, :C_out, :N]


# ----------------------------- Parameter init (deterministic, synthetic) -----------------------------

def init_params(key, in_feat, out_feats, eps=1e-5):
    # TODO(synk): BatchNorm is applied in inference mode (folded to per-channel affine);
    # training-mode batch statistics are not computed in-kernel.
    layers = []
    c_prev = 2 * in_feat
    keys = jax.random.split(key, 4 * len(out_feats) + 4)
    ki = 0
    for c_out in out_feats:
        w = 0.2 * jax.random.normal(keys[ki], (c_prev, c_out), jnp.float32); ki += 1
        gamma = 1.0 + 0.1 * jax.random.normal(keys[ki], (1, c_out), jnp.float32); ki += 1
        beta = 0.1 * jax.random.normal(keys[ki], (1, c_out), jnp.float32); ki += 1
        rmean = 0.1 * jax.random.normal(keys[ki], (1, c_out), jnp.float32); ki += 1
        rvar = jnp.ones((1, c_out), jnp.float32)
        scale = gamma / jnp.sqrt(rvar + eps)
        shift = beta - rmean * scale
        layers.append((w, scale, shift))
        c_prev = c_out
    c_last = out_feats[-1]
    if in_feat == c_last:
        # PyTorch uses sc = features (identity shortcut) when in_feat == out_feats[-1].
        wsc = jnp.eye(in_feat, dtype=jnp.float32)
        ssc = jnp.ones((1, c_last), jnp.float32)
        bsc = jnp.zeros((1, c_last), jnp.float32)
    else:
        wsc = 0.2 * jax.random.normal(keys[ki], (in_feat, c_last), jnp.float32); ki += 1
        gamma = 1.0 + 0.1 * jax.random.normal(keys[ki], (1, c_last), jnp.float32); ki += 1
        beta = 0.1 * jax.random.normal(keys[ki], (1, c_last), jnp.float32); ki += 1
        rmean = 0.1 * jax.random.normal(keys[ki], (1, c_last), jnp.float32); ki += 1
        rvar = jnp.ones((1, c_last), jnp.float32)
        ssc = gamma / jnp.sqrt(rvar + eps)
        bsc = beta - rmean * ssc
    return {"layers": layers, "wsc": wsc, "ssc": ssc, "bsc": bsc}


# ----------------------------- Pure-JAX reference (for correctness check) -----------------------------

def ref_forward(points, features, params, k):
    B, C, N = features.shape
    idx = knn_jax(points, k)
    f_bnc = jnp.transpose(features, (0, 2, 1))                    # (B, N, C)
    nbr = f_bnc[jnp.arange(B)[:, None, None], idx, :]             # (B, N, k, C)
    ctr = jnp.broadcast_to(f_bnc[:, :, None, :], (B, N, k, C))
    x = jnp.concatenate([ctr, nbr - ctr], axis=-1)                # (B, N, k, 2C)
    for (w, s, b) in params["layers"]:
        x = jnp.maximum(jnp.einsum("bnkc,cd->bnkd", x, w) * s[0] + b[0], 0.0)
    fts = x.mean(axis=2)                                          # (B, N, C_out)
    sc = jnp.einsum("bnc,cd->bnd", f_bnc, params["wsc"]) * params["ssc"][0] + params["bsc"][0]
    out = jnp.maximum(sc + fts, 0.0)
    return jnp.transpose(out, (0, 2, 1))


# ----------------------------- Main -----------------------------

if __name__ == "__main__":
    B, C_p, C_in, N, K = 2, 3, 8, 16, 4
    out_feats = (32, 32, 32)

    key = jax.random.PRNGKey(0)
    kp, kf, kw = jax.random.split(key, 3)
    points = jax.random.normal(kp, (B, C_p, N), jnp.float32)
    features = jax.random.normal(kf, (B, C_in, N), jnp.float32)
    params = init_params(kw, C_in, out_feats)

    ref = ref_forward(points, features, params, K)

    # f32 matmul-input path: tight correctness check.
    out_f32 = edge_conv_block(points, features, params, K, compute_dtype=jnp.float32)
    out_f32 = jax.block_until_ready(out_f32)
    assert out_f32.shape == (B, out_feats[-1], N)
    np.testing.assert_allclose(np.asarray(out_f32), np.asarray(ref), rtol=1e-4, atol=1e-4)

    # bf16 matmul-input path (v6e/v7x MXU-native, f32 accumulation, bf16 layer epilogue).
    out_bf16 = edge_conv_block(points, features, params, K, compute_dtype=jnp.bfloat16)
    out_bf16 = jax.block_until_ready(out_bf16)
    np.testing.assert_allclose(np.asarray(out_bf16), np.asarray(ref), rtol=1e-1, atol=1e-1)

    print("KERNEL_OK")
</pallas_src>

<mosaic_0001>
module attributes {stable_mosaic.version = 11 : i64} {
  func.func @kernel(%arg0: i32, %arg1: i32, %arg2: memref<1x4x128x8xf32, #tpu.memory_space<vmem>>, %arg3: memref<1x128x8xf32, #tpu.memory_space<vmem>>, %arg4: memref<8x128xf32, #tpu.memory_space<vmem>>, %arg5: memref<8x128xf32, #tpu.memory_space<vmem>>, %arg6: memref<1x128xf32, #tpu.memory_space<vmem>>, %arg7: memref<128x128xf32, #tpu.memory_space<vmem>>, %arg8: memref<1x128xf32, #tpu.memory_space<vmem>>, %arg9: memref<128x128xf32, #tpu.memory_space<vmem>>, %arg10: memref<1x128xf32, #tpu.memory_space<vmem>>, %arg11: memref<8x128xf32, #tpu.memory_space<vmem>>, %arg12: memref<1x128xf32, #tpu.memory_space<vmem>>, %arg13: memref<1x128x128xf32, #tpu.memory_space<vmem>>) attributes {dimension_semantics = [#tpu.dimension_semantics<parallel>, #tpu.dimension_semantics<parallel>], iteration_bounds = array<i64: 2, 1>, scalar_prefetch = 0 : i64, scratch_operands = 0 : i64, tpu.core_type = #tpu.core_type<tc>, window_params = [{transform_indices = @transform_0, window_bounds = array<i64: 1, 4, 128, 8>}, {transform_indices = @transform_1, window_bounds = array<i64: 1, 128, 8>}, {pipeline_mode = #tpu.pipeline_mode<synchronous>, transform_indices = @transform_2, window_bounds = array<i64: 8, 128>}, {pipeline_mode = #tpu.pipeline_mode<synchronous>, transform_indices = @transform_3, window_bounds = array<i64: 8, 128>}, {pipeline_mode = #tpu.pipeline_mode<synchronous>, transform_indices = @transform_4, window_bounds = array<i64: 1, 128>}, {pipeline_mode = #tpu.pipeline_mode<synchronous>, transform_indices = @transform_5, window_bounds = array<i64: 128, 128>}, {pipeline_mode = #tpu.pipeline_mode<synchronous>, transform_indices = @transform_6, window_bounds = array<i64: 1, 128>}, {pipeline_mode = #tpu.pipeline_mode<synchronous>, transform_indices = @transform_7, window_bounds = array<i64: 128, 128>}, {pipeline_mode = #tpu.pipeline_mode<synchronous>, transform_indices = @transform_8, window_bounds = array<i64: 1, 128>}, {pipeline_mode = #tpu.pipeline_mode<synchronous>, transform_indices = @transform_9, window_bounds = array<i64: 8, 128>}, {pipeline_mode = #tpu.pipeline_mode<synchronous>, transform_indices = @transform_10, window_bounds = array<i64: 1, 128>}, {transform_indices = @transform_11, window_bounds = array<i64: 1, 128, 128>}]} {
    %c0 = arith.constant 0 : index
    %c0_0 = arith.constant 0 : index
    %c0_1 = arith.constant 0 : index
    %0 = vector.load %arg3[%c0, %c0_0, %c0_1] : memref<1x128x8xf32, #tpu.memory_space<vmem>>, vector<1x128x8xf32>
    %1 = vector.shape_cast %0 : vector<1x128x8xf32> to vector<128x8xf32>
    %c0_2 = arith.constant 0 : index
    %c0_3 = arith.constant 0 : index
    %c0_4 = arith.constant 0 : index
    %c0_5 = arith.constant 0 : index
    %2 = vector.load %arg2[%c0_2, %c0_3, %c0_4, %c0_5] : memref<1x4x128x8xf32, #tpu.memory_space<vmem>>, vector<1x4x128x8xf32>
    %3 = vector.shape_cast %2 : vector<1x4x128x8xf32> to vector<4x128x8xf32>
    %4 = vector.shape_cast %3 : vector<4x128x8xf32> to vector<512x8xf32>
    %c0_6 = arith.constant 0 : index
    %c0_7 = arith.constant 0 : index
    %5 = vector.load %arg4[%c0_6, %c0_7] : memref<8x128xf32, #tpu.memory_space<vmem>>, vector<8x128xf32>
    %c0_8 = arith.constant 0 : index
    %c0_9 = arith.constant 0 : index
    %6 = vector.load %arg5[%c0_8, %c0_9] : memref<8x128xf32, #tpu.memory_space<vmem>>, vector<8x128xf32>
    %c0_10 = arith.constant 0 : index
    %c0_11 = arith.constant 0 : index
    %7 = vector.load %arg6[%c0_10, %c0_11] : memref<1x128xf32, #tpu.memory_space<vmem>>, vector<1x128xf32>
    %cst = arith.constant dense<0.000000e+00> : vector<128x128xf32>
    %8 = tpu.matmul %1, %5, %cst {dimension_numbers = #tpu.dot_dimension_numbers<[1], [0], [0], [1], [0, 0, 1, 1], [], []>} : vector<128x8xf32>, vector<8x128xf32>, vector<128x128xf32> -> vector<128x128xf32>
    %cst_12 = arith.constant dense<0.000000e+00> : vector<512x128xf32>
    %9 = tpu.matmul %4, %6, %cst_12 {dimension_numbers = #tpu.dot_dimension_numbers<[1], [0], [0], [1], [0, 0, 1, 1], [], []>} : vector<512x8xf32>, vector<8x128xf32>, vector<512x128xf32> -> vector<512x128xf32>
    %10 = vector.shape_cast %9 : vector<512x128xf32> to vector<4x128x128xf32>
    %11 = vector.shape_cast %8 : vector<128x128xf32> to vector<1x128x128xf32>
    %12 = vector.broadcast %11 : vector<1x128x128xf32> to vector<4x128x128xf32>
    %13 = arith.addf %10, %12 : vector<4x128x128xf32>
    %14 = vector.shape_cast %7 : vector<1x128xf32> to vector<1x1x128xf32>
    %15 = vector.broadcast %14 : vector<1x1x128xf32> to vector<4x128x128xf32>
    %16 = arith.addf %13, %15 : vector<4x128x128xf32>
    %cst_13 = arith.constant 0.000000e+00 : f32
    %17 = vector.broadcast %cst_13 : f32 to vector<4x128x128xf32>
    %18 = arith.maximumf %16, %17 : vector<4x128x128xf32>
    %19 = vector.shape_cast %18 : vector<4x128x128xf32> to vector<512x128xf32>
    %c0_14 = arith.constant 0 : index
    %c0_15 = arith.constant 0 : index
    %20 = vector.load %arg7[%c0_14, %c0_15] : memref<128x128xf32, #tpu.memory_space<vmem>>, vector<128x128xf32>
    %c0_16 = arith.constant 0 : index
    %c0_17 = arith.constant 0 : index
    %21 = vector.load %arg8[%c0_16, %c0_17] : memref<1x128xf32, #tpu.memory_space<vmem>>, vector<1x128xf32>
    %cst_18 = arith.constant dense<0.000000e+00> : vector<512x128xf32>
    %22 = tpu.matmul %19, %20, %cst_18 {dimension_numbers = #tpu.dot_dimension_numbers<[1], [0], [0], [1], [0, 0, 1, 1], [], []>} : vector<512x128xf32>, vector<128x128xf32>, vector<512x128xf32> -> vector<512x128xf32>
    %23 = vector.broadcast %21 : vector<1x128xf32> to vector<512x128xf32>
    %24 = arith.addf %22, %23 : vector<512x128xf32>
    %cst_19 = arith.constant 0.000000e+00 : f32
    %25 = vector.broadcast %cst_19 : f32 to vector<512x128xf32>
    %26 = arith.maximumf %24, %25 : vector<512x128xf32>
    %c0_20 = arith.constant 0 : index
    %c0_21 = arith.constant 0 : index
    %27 = vector.load %arg9[%c0_20, %c0_21] : memref<128x128xf32, #tpu.memory_space<vmem>>, vector<128x128xf32>
    %c0_22 = arith.constant 0 : index
    %c0_23 = arith.constant 0 : index
    %28 = vector.load %arg10[%c0_22, %c0_23] : memref<1x128xf32, #tpu.memory_space<vmem>>, vector<1x128xf32>
    %cst_24 = arith.constant dense<0.000000e+00> : vector<512x128xf32>
    %29 = tpu.matmul %26, %27, %cst_24 {dimension_numbers = #tpu.dot_dimension_numbers<[1], [0], [0], [1], [0, 0, 1, 1], [], []>} : vector<512x128xf32>, vector<128x128xf32>, vector<512x128xf32> -> vector<512x128xf32>
    %30 = vector.broadcast %28 : vector<1x128xf32> to vector<512x128xf32>
    %31 = arith.addf %29, %30 : vector<512x128xf32>
    %cst_25 = arith.constant 0.000000e+00 : f32
    %32 = vector.broadcast %cst_25 : f32 to vector<512x128xf32>
    %33 = arith.maximumf %31, %32 : vector<512x128xf32>
    %34 = vector.shape_cast %33 : vector<512x128xf32> to vector<4x128x128xf32>
    %cst_26 = arith.constant dense<0.000000e+00> : vector<128x128xf32>
    %35 = vector.multi_reduction <add>, %34, %cst_26 [0] : vector<4x128x128xf32> to vector<128x128xf32>
    %cst_27 = arith.constant 2.500000e-01 : f32
    %36 = vector.broadcast %cst_27 : f32 to vector<128x128xf32>
    %37 = arith.mulf %35, %36 : vector<128x128xf32>
    %c0_28 = arith.constant 0 : index
    %c0_29 = arith.constant 0 : index
    %38 = vector.load %arg11[%c0_28, %c0_29] : memref<8x128xf32, #tpu.memory_space<vmem>>, vector<8x128xf32>
    %c0_30 = arith.constant 0 : index
    %c0_31 = arith.constant 0 : index
    %39 = vector.load %arg12[%c0_30, %c0_31] : memref<1x128xf32, #tpu.memory_space<vmem>>, vector<1x128xf32>
    %cst_32 = arith.constant dense<0.000000e+00> : vector<128x128xf32>
    %40 = tpu.matmul %1, %38, %cst_32 {dimension_numbers = #tpu.dot_dimension_numbers<[1], [0], [0], [1], [0, 0, 1, 1], [], []>} : vector<128x8xf32>, vector<8x128xf32>, vector<128x128xf32> -> vector<128x128xf32>
    %41 = vector.broadcast %39 : vector<1x128xf32> to vector<128x128xf32>
    %42 = arith.addf %40, %41 : vector<128x128xf32>
    %43 = arith.addf %42, %37 : vector<128x128xf32>
    %cst_33 = arith.constant 0.000000e+00 : f32
    %44 = vector.broadcast %cst_33 : f32 to vector<128x128xf32>
    %45 = arith.maximumf %43, %44 : vector<128x128xf32>
    %46 = tpu.transpose %45, [1, 0] : vector<128x128xf32> -> vector<128x128xf32>
    %c0_34 = arith.constant 0 : index
    %c0_35 = arith.constant 0 : index
    %c0_36 = arith.constant 0 : index
    %47 = vector.load %arg13[%c0_34, %c0_35, %c0_36] : memref<1x128x128xf32, #tpu.memory_space<vmem>>, vector<1x128x128xf32>
    %48 = vector.shape_cast %47 : vector<1x128x128xf32> to vector<128x128xf32>
    %49 = vector.shape_cast %46 : vector<128x128xf32> to vector<1x128x128xf32>
    tpu.vector_store %arg13[%c0_34, %c0_35, %c0_36], %49 {strides = array<i32>} : memref<1x128x128xf32, #tpu.memory_space<vmem>>, vector<1x128x128xf32>,
    return
  }
  func.func @transform_0(%arg0: i32, %arg1: i32) -> (i32, i32, i32, i32) {
    %c0_i32 = arith.constant 0 : i32
    %c0_i32_0 = arith.constant 0 : i32
    %c0_i32_1 = arith.constant 0 : i32
    return %arg0, %c0_i32, %arg1, %c0_i32_0 : i32, i32, i32, i32
  }
  func.func @transform_1(%arg0: i32, %arg1: i32) -> (i32, i32, i32) {
    %c0_i32 = arith.constant 0 : i32
    %c0_i32_0 = arith.constant 0 : i32
    return %arg0, %arg1, %c0_i32 : i32, i32, i32
  }
  func.func @transform_2(%arg0: i32, %arg1: i32) -> (i32, i32) {
    %c0_i32 = arith.constant 0 : i32
    %c0_i32_0 = arith.constant 0 : i32
    %c0_i32_1 = arith.constant 0 : i32
    return %c0_i32, %c0_i32_0 : i32, i32
  }
  func.func @transform_3(%arg0: i32, %arg1: i32) -> (i32, i32) {
    %c0_i32 = arith.constant 0 : i32
    %c0_i32_0 = arith.constant 0 : i32
    %c0_i32_1 = arith.constant 0 : i32
    return %c0_i32, %c0_i32_0 : i32, i32
  }
  func.func @transform_4(%arg0: i32, %arg1: i32) -> (i32, i32) {
    %c0_i32 = arith.constant 0 : i32
    %c0_i32_0 = arith.constant 0 : i32
    %c0_i32_1 = arith.constant 0 : i32
    return %c0_i32, %c0_i32_0 : i32, i32
  }
  func.func @transform_5(%arg0: i32, %arg1: i32) -> (i32, i32) {
    %c0_i32 = arith.constant 0 : i32
    %c0_i32_0 = arith.constant 0 : i32
    %c0_i32_1 = arith.constant 0 : i32
    return %c0_i32, %c0_i32_0 : i32, i32
  }
  func.func @transform_6(%arg0: i32, %arg1: i32) -> (i32, i32) {
    %c0_i32 = arith.constant 0 : i32
    %c0_i32_0 = arith.constant 0 : i32
    %c0_i32_1 = arith.constant 0 : i32
    return %c0_i32, %c0_i32_0 : i32, i32
  }
  func.func @transform_7(%arg0: i32, %arg1: i32) -> (i32, i32) {
    %c0_i32 = arith.constant 0 : i32
    %c0_i32_0 = arith.constant 0 : i32
    %c0_i32_1 = arith.constant 0 : i32
    return %c0_i32, %c0_i32_0 : i32, i32
  }
  func.func @transform_8(%arg0: i32, %arg1: i32) -> (i32, i32) {
    %c0_i32 = arith.constant 0 : i32
    %c0_i32_0 = arith.constant 0 : i32
    %c0_i32_1 = arith.constant 0 : i32
    return %c0_i32, %c0_i32_0 : i32, i32
  }
  func.func @transform_9(%arg0: i32, %arg1: i32) -> (i32, i32) {
    %c0_i32 = arith.constant 0 : i32
    %c0_i32_0 = arith.constant 0 : i32
    %c0_i32_1 = arith.constant 0 : i32
    return %c0_i32, %c0_i32_0 : i32, i32
  }
  func.func @transform_10(%arg0: i32, %arg1: i32) -> (i32, i32) {
    %c0_i32 = arith.constant 0 : i32
    %c0_i32_0 = arith.constant 0 : i32
    %c0_i32_1 = arith.constant 0 : i32
    return %c0_i32, %c0_i32_0 : i32, i32
  }
  func.func @transform_11(%arg0: i32, %arg1: i32) -> (i32, i32, i32) {
    %c0_i32 = arith.constant 0 : i32
    %c0_i32_0 = arith.constant 0 : i32
    return %arg0, %c0_i32, %arg1 : i32, i32, i32
  }
}

</mosaic_0001>

<bundles_post_ra>
// kernel: tpu_custom_call.1
= control target key start
LH: loop header
LB: loop body
LE: loop exit
PB: predicated region body
PF: predicated region fallthrough
CT: control target
= control target key end

     0   :  { %s4992_s0 = inlined_call_operand.vmem [shape: f32[2,4,128,8], index: 0, kind: input, shape index: {}]   ;;  %s4993_s1 = inlined_call_operand.vmem [shape: f32[2,128,8], index: 1, kind: input, shape index: {}]   ;;  %s4994_s2 = inlined_call_operand.vmem [shape: f32[8,128], index: 2, kind: input, shape index: {}]   ;;  %s4995_s3 = inlined_call_operand.vmem [shape: f32[8,128], index: 3, kind: input, shape index: {}]   ;;  %s4996_s4 = inlined_call_operand.vmem [shape: f32[1,128], index: 4, kind: input, shape index: {}]   ;;  %s4997_s5 = inlined_call_operand.vmem [shape: f32[128,128], index: 5, kind: input, shape index: {}]   ;;  %s4998_s6 = inlined_call_operand.vmem [shape: f32[1,128], index: 6, kind: input, shape index: {}]   ;;  %s4999_s7 = inlined_call_operand.vmem [shape: f32[128,128], index: 7, kind: input, shape index: {}]   ;;  %s5000_s8 = inlined_call_operand.vmem [shape: f32[1,128], index: 8, kind: input, shape index: {}]   ;;  %s5001_s9 = inlined_call_operand.vmem [shape: f32[8,128], index: 9, kind: input, shape index: {}]   ;;  %s5002_s10 = inlined_call_operand.vmem [shape: f32[1,128], index: 10, kind: input, shape index: {}]   ;;  %s5003_s11 = inlined_call_operand.hbm [shape: f32[2,128,128], index: 11, kind: output, shape index: {}]  }
   0x1   :  { %5004 = sst [smem:[#allocation7_spill]] %s4994_s2 }
   0x2   :  { %16 = vsyncpa [#allocation3], 0 }
   0x3   :  { %18 = vsyncpa [#allocation3 + $0x1], 0  ;;  %s3920_s17 = smov 0   ;;  %s3922_s18 = smov 0  }
   0x4   :  { %s3924_s19 = smov 0   ;;  %s3926_s20 = smov 0  }
   0x5   :  { %s3928_s21 = smov 0   ;;  %s3930_s22 = smov 0  }
   0x6 LB: > { %s2855_s23 = sadd.s32 4294967295, %s3855_s22   ;;  %s2856_s24 = sadd.s32 4294967294, %s3855_s22   ;;  %s3855_s22 = sphi %s3930_s22, %s24_s22   ;;  %s3851_s21 = sphi %s3928_s21, %s5016_s21   ;;  %s3847_s20 = sphi %s3926_s20, %s5015_s20   ;;  %s3843_s19 = sphi %s3924_s19, %s5014_s19   ;;  %s3839_s18 = sphi %s3922_s18, %s5013_s18   ;;  %s3835_s17 = sphi %s3920_s17, %s5012_s17  }
   0x7   : > { %s36_s25 = sadd.s32 1, %s3851_s21  ;;  %s290_s26 = sadd.s32 1, %s3843_s19 }
   0x8   : > { %p38_p0 = scmp.ge.s32.totalorder %s36_s25, 2  ;;  %p300_p1 = scmp.ne.s32.totalorder %s3843_s19, %s3839_s18 }
   0x9   : > { %p301_p2 = scmp.eq.s32.totalorder %s2855_s23, 1  ;;  %p306_p3 = scmp.ne.s32.totalorder %s3839_s18, %s3835_s17 }
   0xa   : > { %s5018_s25 = smov (%p38_p0, %s36_s25), 0  ;;  %p307_p5 = scmp.eq.s32.totalorder %s2856_s24, 1 }
   0xb   : > { %p3960_p4 = por %p301_p2, %p300_p1  ;;  %s285_s28 = ssub.s32 %s3851_s21, %s5018_s25 }
   0xc   : > { %p2859_p6 = scmp.ge.s32.totalorder %s3855_s22, 1  ;;  %p288_p7 = scmp.eq.s32.totalorder %s285_s28, 0 }
   0xd   : > { %p3967_p8 = por %p307_p5, %p306_p3  ;;  %p378_p9 = scmp.lt.s32.totalorder %s3855_s22, 3 }
   0xe   : > { %s3973_s30 = scalar_select %p288_p7, %s3843_s19, %s290_s26  }
   0xf   : > { %p379_p10 = pnand %p2859_p6, %p378_p9 }
  0x11   : > { %382 = sbr.rel (%p379_p10) target bundleno = 1029 (0x405), region = 64 }
  0x18   : > { %s5007_s2 = sld [smem:[#allocation7_spill]]  ;;  %v532_v1 = vld [vmem:[%s4995_s3] sm:$0xff]  ;;  %p432_p11 = scmp.lt.s32.totalorder %s3847_s20, 1  ;;  %vm534_vm0 = vcmask 64512  }
  0x19   : > { %3702 = vmatprep.subr.mxu1 %v532_v1  ;;  %s428_s15 = sand.u32 1, %s3839_s18  }
  0x1a   : > { %s433_s16 = scalar_select %p432_p11, %s3847_s20, 1  ;;  %3703 = vmatpush3.msra.mxu1 %v532_v1 }
  0x1c   : > { %s2970_s23 = sshll.u32 %s433_s16, 9  ;;  %s2971_s24 = sshll.u32 %s433_s16, 7 }
  0x1d   : > { %s3986_s12 = scalar_lea.vmem %s4992_s0, %s2970_s23  ;;  %s3991_s14 = scalar_lea.vmem %s4993_s1, %s2971_s24 }
  0x1e   : > { %v531_v0 = vld [vmem:[%s5007_s2] sm:$0xff]  ;;  %v452_v4 = vld [vmem:[%s3991_s14 + $0x8] sm:$0xff]  ;;  %v453_v6 = vld [vmem:[%s3991_s14 + $0x10] sm:$0xff]  ;;  %s2860_s16 = sshll.u32 %s428_s15, 7  ;;  %s2972_s24 = sshll.u32 %s3847_s20, 11 }
  0x1f   : > { %3232 = vmatprep.subr.mxu0 %v531_v0  ;;  %v451_v2 = vld [vmem:[%s3991_s14] sm:$0xff]  ;;  %v484_v5 = vld [vmem:[%s3986_s12 + $0x88] sm:$0xff]  ;;  %v485_v7 = vld [vmem:[%s3986_s12 + $0x90] sm:$0xff]  ;;  %s4917_s23 = scalar_lea.vmem [#allocation2], %s2860_s16  ;;  %s4939_s13 = scalar_lea.hbm %s5003_s11, %s2972_s24 }
  0x20   : > { %3233 = vmatpush3.msra.mxu0 %v531_v0  ;;  %v483_v3 = vld [vmem:[%s3986_s12 + $0x80] sm:$0xff]  ;;  %3234 = vmatprep.mubr.msk.f32.mxu0 %vm534_vm0, %v451_v2  ;;  %v454_v8 = vld [vmem:[%s3991_s14 + $0x18] sm:$0xff]  ;;  %v456_v12 = vld [vmem:[%s3991_s14 + $0x28] sm:$0xff]  ;;  %s2759_s26 = sshll.u32 %s4917_s23, 4  ;;  %s3857_s20 = smov [#allocation2]   ;;  %s4941_s26 = int_to_ptr.vmem [resolvable:$true] %s2759_s26 }
  0x21   : > { %3258 = vmatprep.subr.mxu0 %v532_v1  ;;  %3284 = vmatprep.mubr.msk.f32.mxu1 %vm534_vm0, %v483_v3  ;;  %v486_v9 = vld [vmem:[%s3986_s12 + $0x98] sm:$0xff]  ;;  %v455_v10 = vld [vmem:[%s3991_s14 + $0x20] sm:$0xff]  ;;  %v488_v13 = vld [vmem:[%s3986_s12 + $0xa8] sm:$0xff]  ;;  %s3777_s2 = scalar_lea.vmem %s4941_s26, 2048  ;;  %s3781_s16 = sshll.u32 %s3857_s20, 4  ;;  %s3782_s16 = int_to_ptr.vmem [resolvable:$false] %s3781_s16 }
  0x22   : > { %3235 = vmatmul.mubr.msk.f32.vlgmr.msra.gmra.mrb[0].mxu0 %vm534_vm0, %v452_v4  ;;  %3285 = vmatmul.mubr.msk.f32.vlgmr.msra.gmra.mrb[0].mxu1 %vm534_vm0, %v484_v5  ;;  %v487_v11 = vld [vmem:[%s3986_s12 + $0xa0] sm:$0xff]  ;;  %v457_v14 = vld [vmem:[%s3991_s14 + $0x30] sm:$0xff]  ;;  %v458_v16 = vld [vmem:[%s3991_s14 + $0x38] sm:$0xff]  ;;  %p3778_p12 = scmp.ne.s32.totalorder %s4941_s26, %s3777_s2  ;;  %s3783_s24 = scalar_lea.vmem %s3782_s16, 4096 }
  0x23   : > { %3259 = vmatpush3.msra.mxu0 %v532_v1  ;;  %3237 = vmatprep.mubr.msk.f32.mxu0 %vm534_vm0, %v453_v6  ;;  %v489_v15 = vld [vmem:[%s3986_s12 + $0xb0] sm:$0xff]  ;;  %v490_v17 = vld [vmem:[%s3986_s12 + $0xb8] sm:$0xff]  ;;  %v459_v18 = vld [vmem:[%s3991_s14 + $0x40] sm:$0xff]  ;;  %p3784_p1 = scmp.lt.s32.totalorder %s4941_s26, %s3782_s16  ;;  %p3785_p2 = scmp.lt.s32.totalorder %s3783_s24, %s3777_s2 }
  0x24   : > { %3287 = vmatprep.mubr.msk.f32.mxu1 %vm534_vm0, %v485_v7  ;;  %v491_v19 = vld [vmem:[%s3986_s12 + $0xc0] sm:$0xff]  ;;  %v460_v20 = vld [vmem:[%s3991_s14 + $0x48] sm:$0xff]  ;;  %v461_v22 = vld [vmem:[%s3991_s14 + $0x50] sm:$0xff]  ;;  %p3779_p13 = pnand %p3778_p12, %p3960_p4 }
  0x25   : > { %v492_v21 = vld [vmem:[%s3986_s12 + $0xc8] sm:$0xff]  ;;  %v493_v23 = vld [vmem:[%s3986_s12 + $0xd0] sm:$0xff]  ;;  %v462_v24 = vld [vmem:[%s3991_s14 + $0x58] sm:$0xff]  ;;  %p3786_p3 = por %p3785_p2, %p3784_p1 }
  0x26   : > { %3238 = vmatmul.mubr.msk.f32.gmra.mrb[2].mxu0 %vm534_vm0, %v454_v8  ;;  %3288 = vmatmul.mubr.msk.f32.gmra.mrb[2].mxu1 %vm534_vm0, %v486_v9  ;;  %v494_v25 = vld [vmem:[%s3986_s12 + $0xd8] sm:$0xff]  ;;  %v463_v26 = vld [vmem:[%s3991_s14 + $0x60] sm:$0xff]  ;;  %v464_v28 = vld [vmem:[%s3991_s14 + $0x68] sm:$0xff]  ;;  %p3780_p0 = pneg %p3779_p13 }
  0x27   : > { %3240 = vmatprep.mubr.msk.f32.mxu0 %vm534_vm0, %v455_v10  ;;  %3290 = vmatprep.mubr.msk.f32.mxu1 %vm534_vm0, %v487_v11  ;;  %v495_v27 = vld [vmem:[%s3986_s12 + $0xe0] sm:$0xff]  ;;  %v496_v29 = vld [vmem:[%s3986_s12 + $0xe8] sm:$0xff]  ;;  %v465_v30 = vld [vmem:[%s3991_s14 + $0x70] sm:$0xff] }
  0x28   : > { %v497_v31 = vld [vmem:[%s3986_s12 + $0xf0] sm:$0xff]  ;;  %v466_v32 = vld [vmem:[%s3991_s14 + $0x78] sm:$0xff]  ;;  %v467_v34 = vld [vmem:[%s3986_s12] sm:$0xff]  ;;  %p3787_p5 = pnand %p3786_p3, %p3780_p0 }
  0x29   : > { %v498_v33 = vld [vmem:[%s3986_s12 + $0xf8] sm:$0xff]  ;;  %v499_v35 = vld [vmem:[%s3986_s12 + $0x100] sm:$0xff]  ;;  %v468_v36 = vld [vmem:[%s3986_s12 + $0x8] sm:$0xff] }
  0x2a   : > { %3241 = vmatmul.mubr.msk.f32.gmra.mrb[4].mxu0 %vm534_vm0, %v456_v12  ;;  %3291 = vmatmul.mubr.msk.f32.gmra.mrb[4].mxu1 %vm534_vm0, %v488_v13  ;;  %v500_v37 = vld [vmem:[%s3986_s12 + $0x108] sm:$0xff]  ;;  %v469_v38 = vld [vmem:[%s3986_s12 + $0x10] sm:$0xff]  ;;  %v470_v40 = vld [vmem:[%s3986_s12 + $0x18] sm:$0xff] }
  0x2b   : > { %3243 = vmatprep.mubr.msk.f32.mxu0 %vm534_vm0, %v457_v14  ;;  %3293 = vmatprep.mubr.msk.f32.mxu1 %vm534_vm0, %v489_v15  ;;  %v501_v39 = vld [vmem:[%s3986_s12 + $0x110] sm:$0xff]  ;;  %v502_v41 = vld [vmem:[%s3986_s12 + $0x118] sm:$0xff]  ;;  %v471_v42 = vld [vmem:[%s3986_s12 + $0x20] sm:$0xff] }
  0x2c   : > { %v503_v43 = vld [vmem:[%s3986_s12 + $0x120] sm:$0xff]  ;;  %v472_v44 = vld [vmem:[%s3986_s12 + $0x28] sm:$0xff]  ;;  %v473_v46 = vld [vmem:[%s3986_s12 + $0x30] sm:$0xff] }
  0x2d   : > { %v504_v45 = vld [vmem:[%s3986_s12 + $0x128] sm:$0xff]  ;;  %v505_v47 = vld [vmem:[%s3986_s12 + $0x130] sm:$0xff]  ;;  %v474_v48 = vld [vmem:[%s3986_s12 + $0x38] sm:$0xff] }
  0x2e   : > { %3244 = vmatmul.mubr.msk.f32.gmra.mrb[6].mxu0 %vm534_vm0, %v458_v16  ;;  %3294 = vmatmul.mubr.msk.f32.gmra.mrb[6].mxu1 %vm534_vm0, %v490_v17  ;;  %v506_v49 = vld [vmem:[%s3986_s12 + $0x138] sm:$0xff]  ;;  %v475_v50 = vld [vmem:[%s3986_s12 + $0x40] sm:$0xff]  ;;  %v476_v52 = vld [vmem:[%s3986_s12 + $0x48] sm:$0xff] }
  0x2f   : > { %3246 = vmatprep.mubr.msk.f32.mxu0 %vm534_vm0, %v459_v18  ;;  %3296 = vmatprep.mubr.msk.f32.mxu1 %vm534_vm0, %v491_v19  ;;  %v507_v51 = vld [vmem:[%s3986_s12 + $0x140] sm:$0xff]  ;;  %v508_v53 = vld [vmem:[%s3986_s12 + $0x148] sm:$0xff]  ;;  %v477_v54 = vld [vmem:[%s3986_s12 + $0x50] sm:$0xff] }
  0x30   : > { %v509_v55 = vld [vmem:[%s3986_s12 + $0x150] sm:$0xff]  ;;  %v478_v56 = vld [vmem:[%s3986_s12 + $0x58] sm:$0xff]  ;;  %v479_v58 = vld [vmem:[%s3986_s12 + $0x60] sm:$0xff] }
  0x31   : > { %v510_v57 = vld [vmem:[%s3986_s12 + $0x158] sm:$0xff]  ;;  %v511_v59 = vld [vmem:[%s3986_s12 + $0x160] sm:$0xff]  ;;  %v480_v60 = vld [vmem:[%s3986_s12 + $0x68] sm:$0xff] }
  0x32   : > { %3247 = vmatmul.mubr.msk.f32.gmra.mrb[8].mxu0 %vm534_vm0, %v460_v20  ;;  %3297 = vmatmul.mubr.msk.f32.gmra.mrb[8].mxu1 %vm534_vm0, %v492_v21  ;;  %v512_v61 = vld [vmem:[%s3986_s12 + $0x168] sm:$0xff]  ;;  %v481_v62 = vld [vmem:[%s3986_s12 + $0x70] sm:$0xff]  ;;  %v482_v0 = vld [vmem:[%s3986_s12 + $0x78] sm:$0xff] }
  0x33   : > { %3249 = vmatprep.mubr.msk.f32.mxu0 %vm534_vm0, %v461_v22  ;;  %3299 = vmatprep.mubr.msk.f32.mxu1 %vm534_vm0, %v493_v23  ;;  %v513_v63 = vld [vmem:[%s3986_s12 + $0x170] sm:$0xff]  ;;  %v514_v1 = vld [vmem:[%s3986_s12 + $0x178] sm:$0xff]  ;;  %v515_v2 = vld [vmem:[%s3986_s12 + $0x180] sm:$0xff] }
  0x34   : > { %v516_v3 = vld [vmem:[%s3986_s12 + $0x188] sm:$0xff]  ;;  %v517_v4 = vld [vmem:[%s3986_s12 + $0x190] sm:$0xff]  ;;  %v518_v5 = vld [vmem:[%s3986_s12 + $0x198] sm:$0xff] }
  0x35   : > { %v519_v6 = vld [vmem:[%s3986_s12 + $0x1a0] sm:$0xff]  ;;  %v520_v7 = vld [vmem:[%s3986_s12 + $0x1a8] sm:$0xff]  ;;  %v521_v8 = vld [vmem:[%s3986_s12 + $0x1b0] sm:$0xff] }
  0x36   : > { %3250 = vmatmul.mubr.msk.f32.gmra.mrb[10].mxu0 %vm534_vm0, %v462_v24  ;;  %3300 = vmatmul.mubr.msk.f32.gmra.mrb[10].mxu1 %vm534_vm0, %v494_v25  ;;  %v522_v9 = vld [vmem:[%s3986_s12 + $0x1b8] sm:$0xff]  ;;  %v523_v10 = vld [vmem:[%s3986_s12 + $0x1c0] sm:$0xff]  ;;  %v524_v11 = vld [vmem:[%s3986_s12 + $0x1c8] sm:$0xff] }
  0x37   : > { %3252 = vmatprep.mubr.msk.f32.mxu0 %vm534_vm0, %v463_v26  ;;  %3302 = vmatprep.mubr.msk.f32.mxu1 %vm534_vm0, %v495_v27  ;;  %v525_v12 = vld [vmem:[%s3986_s12 + $0x1d0] sm:$0xff]  ;;  %v526_v13 = vld [vmem:[%s3986_s12 + $0x1d8] sm:$0xff]  ;;  %v527_v14 = vld [vmem:[%s3986_s12 + $0x1e0] sm:$0xff] }
  0x38   : > { %v528_v15 = vld [vmem:[%s3986_s12 + $0x1e8] sm:$0xff]  ;;  %v529_v16 = vld [vmem:[%s3986_s12 + $0x1f0] sm:$0xff]  ;;  %v530_v17 = vld [vmem:[%s3986_s12 + $0x1f8] sm:$0xff]  ;;  %s4946_s12 = scalar_lea.sflag [#allocation3], %s428_s15 }
  0x39   : > { %v1503_v18 = vld [vmem:[%s4997_s5] sm:$0xff]  ;;  %v1504_v19 = vld [vmem:[%s4997_s5 + $0x8] sm:$0xff]  ;;  %v1505_v21 = vld [vmem:[%s4997_s5 + $0x10] sm:$0xff] }
  0x3a   : > { %3253 = vmatmul.mubr.msk.f32.gmra.mrb[12].mxu0 %vm534_vm0, %v464_v28  ;;  %3303 = vmatmul.mubr.msk.f32.gmra.mrb[12].mxu1 %vm534_vm0, %v496_v29  ;;  %v3638_v20 = vpack.c.bf16 %v1504_v19, %v1503_v18  ;;  %v1506_v22 = vld [vmem:[%s4997_s5 + $0x18] sm:$0xff]  ;;  %v1507_v24 = vld [vmem:[%s4997_s5 + $0x20] sm:$0xff]  ;;  %v1508_v25 = vld [vmem:[%s4997_s5 + $0x28] sm:$0xff] }
  0x3b   : > { %3255 = vmatprep.mubr.msk.f32.mxu0 %vm534_vm0, %v465_v30  ;;  %3305 = vmatprep.mubr.msk.f32.mxu1 %vm534_vm0, %v497_v31  ;;  %v3642_v23 = vpack.c.bf16 %v1506_v22, %v1505_v21  ;;  %v3646_v26 = vpack.c.bf16 %v1508_v25, %v1507_v24  ;;  %v1509_v27 = vld [vmem:[%s4997_s5 + $0x30] sm:$0xff]  ;;  %v1510_v28 = vld [vmem:[%s4997_s5 + $0x38] sm:$0xff]  ;;  %v1511_v30 = vld [vmem:[%s4997_s5 + $0x40] sm:$0xff] }
  0x3c   : > { %3639 = vmatprep.subr.bf16.mxu0 %v3638_v20  ;;  %v3650_v29 = vpack.c.bf16 %v1510_v28, %v1509_v27  ;;  %v1512_v31 = vld [vmem:[%s4997_s5 + $0x48] sm:$0xff] }
  0x3e   : > { %3256 = vmatmul.mubr.msk.f32.gmra.mrb[14].mxu0 %vm534_vm0, %v466_v32  ;;  %3306 = vmatmul.mubr.msk.f32.gmra.mrb[14].mxu1 %vm534_vm0, %v498_v33  ;;  %v3654_v32 = vpack.c.bf16 %v1512_v31, %v1511_v30  ;;  %v1513_v33 = vld [vmem:[%s4997_s5 + $0x50] sm:$0xff] }
  0x3f   : > { %3260 = vmatprep.mubr.msk.f32.mxu0 %vm534_vm0, %v467_v34  ;;  %3308 = vmatprep.mubr.msk.f32.mxu1 %vm534_vm0, %v499_v35  ;;  %v1514_v34 = vld [vmem:[%s4997_s5 + $0x58] sm:$0xff] }
  0x40   : > { %v3658_v35 = vpack.c.bf16 %v1514_v34, %v1513_v33 }
  0x42   : > { %3261 = vmatmul.mubr.msk.f32.vlgmr.msra.gmra.mrb[16].mxu0 %vm534_vm0, %v468_v36  ;;  %3309 = vmatmul.mubr.msk.f32.gmra.mrb[16].mxu1 %vm534_vm0, %v500_v37  ;;  %v1515_v36 = vld [vmem:[%s4997_s5 + $0x60] sm:$0xff]  ;;  %v1516_v37 = vld [vmem:[%s4997_s5 + $0x68] sm:$0xff] }
  0x43   : > { %3263 = vmatprep.mubr.msk.f32.mxu0 %vm534_vm0, %v469_v38  ;;  %3311 = vmatprep.mubr.msk.f32.mxu1 %vm534_vm0, %v501_v39  ;;  %v3662_v38 = vpack.c.bf16 %v1516_v37, %v1515_v36  ;;  %v1517_v39 = vld [vmem:[%s4997_s5 + $0x70] sm:$0xff]  ;;  %v1976_v36 = vld [vmem:[%s4999_s7 + $0x8] sm:$0xff] }
  0x44   : > { %3641 = vmatpush3.bf16.msra.mxu0 %v3638_v20 }
  0x45   : > { %3643 = vmatprep.subr.bf16.mxu0 %v3642_v23 }
  0x46   : > { %3264 = vmatmul.mubr.msk.f32.gmra.mrb[18].mxu0 %vm534_vm0, %v470_v40  ;;  %3312 = vmatmul.mubr.msk.f32.gmra.mrb[18].mxu1 %vm534_vm0, %v502_v41  ;;  %v1518_v40 = vld [vmem:[%s4997_s5 + $0x78] sm:$0xff] }
  0x47   : > { %3266 = vmatprep.mubr.msk.f32.mxu0 %vm534_vm0, %v471_v42  ;;  %3314 = vmatprep.mubr.msk.f32.mxu1 %vm534_vm0, %v503_v43  ;;  %v3666_v41 = vpack.c.bf16 %v1518_v40, %v1517_v39 }
  0x48   : > { %3645 = vmatpush3.bf16.msra.mxu0 %v3642_v23 }
  0x49   : > { %3647 = vmatprep.subr.bf16.mxu0 %v3646_v26 }
  0x4a   : > { %3267 = vmatmul.mubr.msk.f32.gmra.mrb[20].mxu0 %vm534_vm0, %v472_v44  ;;  %3315 = vmatmul.mubr.msk.f32.gmra.mrb[20].mxu1 %vm534_vm0, %v504_v45 }
  0x4b   : > { %3269 = vmatprep.mubr.msk.f32.mxu0 %vm534_vm0, %v473_v46  ;;  %3317 = vmatprep.mubr.msk.f32.mxu1 %vm534_vm0, %v505_v47 }
  0x4c   : > { %3649 = vmatpush3.bf16.msra.mxu0 %v3646_v26 }
  0x4d   : > { %3651 = vmatprep.subr.bf16.mxu0 %v3650_v29 }
  0x4e   : > { %3270 = vmatmul.mubr.msk.f32.gmra.mrb[22].mxu0 %vm534_vm0, %v474_v48  ;;  %3318 = vmatmul.mubr.msk.f32.gmra.mrb[22].mxu1 %vm534_vm0, %v506_v49 }
  0x4f   : > { %3272 = vmatprep.mubr.msk.f32.mxu0 %vm534_vm0, %v475_v50  ;;  %3320 = vmatprep.mubr.msk.f32.mxu1 %vm534_vm0, %v507_v51 }
  0x50   : > { %3653 = vmatpush3.bf16.msra.mxu0 %v3650_v29 }
  0x51   : > { %3655 = vmatprep.subr.bf16.mxu0 %v3654_v32 }
  0x52   : > { %3273 = vmatmul.mubr.msk.f32.gmra.mrb[24].mxu0 %vm534_vm0, %v476_v52  ;;  %3321 = vmatmul.mubr.msk.f32.gmra.mrb[24].mxu1 %vm534_vm0, %v508_v53 }
  0x53   : > { %3275 = vmatprep.mubr.msk.f32.mxu0 %vm534_vm0, %v477_v54  ;;  %3323 = vmatprep.mubr.msk.f32.mxu1 %vm534_vm0, %v509_v55 }
  0x54   : > { %3657 = vmatpush3.bf16.msra.mxu0 %v3654_v32  ;;  %v4288_v32 = vld [vmem:[%s4996_s4] ss:$0 sm:$0xff] }
  0x55   : > { %3659 = vmatprep.subr.bf16.mxu0 %v3658_v35 }
  0x56   : > { %3276 = vmatmul.mubr.msk.f32.gmra.mrb[26].mxu0 %vm534_vm0, %v478_v56  ;;  %3324 = vmatmul.mubr.msk.f32.gmra.mrb[26].mxu1 %vm534_vm0, %v510_v57 }
  0x57   : > { %3278 = vmatprep.mubr.msk.f32.mxu0 %vm534_vm0, %v479_v58  ;;  %3326 = vmatprep.mubr.msk.f32.mxu1 %vm534_vm0, %v511_v59 }
  0x58   : > { %3661 = vmatpush3.bf16.msra.mxu0 %v3658_v35  ;;  %v1975_v35 = vld [vmem:[%s4999_s7] sm:$0xff] }
  0x59   : > { %3663 = vmatprep.subr.bf16.mxu0 %v3662_v38 }
  0x5a   : > { %3279 = vmatmul.mubr.msk.f32.gmra.mrb[28].mxu0 %vm534_vm0, %v480_v60  ;;  %3327 = vmatmul.mubr.msk.f32.gmra.mrb[28].mxu1 %vm534_vm0, %v512_v61 }
  0x5b   : > { %3281 = vmatprep.mubr.msk.f32.mxu0 %vm534_vm0, %v481_v62  ;;  %3329 = vmatprep.mubr.msk.f32.mxu1 %vm534_vm0, %v513_v63 }
  0x5c   : > { %3665 = vmatpush3.bf16.msra.mxu0 %v3662_v38  ;;  %v3670_v38 = vpack.c.bf16 %v1976_v36, %v1975_v35 }
  0x5d   : > { %3667 = vmatprep.subr.bf16.mxu0 %v3666_v41 }
  0x5e   : > { %3282 = vmatmul.mubr.msk.f32.gmra.mrb[30].mxu0 %vm534_vm0, %v482_v0  ;;  %3330 = vmatmul.mubr.msk.f32.gmra.mrb[30].mxu1 %vm534_vm0, %v514_v1 }
  0x5f   : > { %3332 = vmatprep.mubr.msk.f32.mxu1 %vm534_vm0, %v515_v2  ;;  %3671 = vmatprep.subr.bf16.mxu1 %v3670_v38 }
  0x60   : > { %3669 = vmatpush3.bf16.msra.mxu0 %v3666_v41  ;;  %3673 = vmatpush3.bf16.msra.mxu1 %v3670_v38 }
  0x62   : > { %3333 = vmatmul.mubr.msk.f32.gmra.mrb[32].mxu1 %vm534_vm0, %v516_v3 }
  0x63   : > { %3335 = vmatprep.mubr.msk.f32.mxu1 %vm534_vm0, %v517_v4 }
  0x66   : > { %3336 = vmatmul.mubr.msk.f32.gmra.mrb[34].mxu1 %vm534_vm0, %v518_v5 }
  0x67   : > { %3338 = vmatprep.mubr.msk.f32.mxu1 %vm534_vm0, %v519_v6 }
  0x6a   : > { %3339 = vmatmul.mubr.msk.f32.gmra.mrb[36].mxu1 %vm534_vm0, %v520_v7 }
  0x6b   : > { %3341 = vmatprep.mubr.msk.f32.mxu1 %vm534_vm0, %v521_v8 }
  0x6e   : > { %3342 = vmatmul.mubr.msk.f32.gmra.mrb[38].mxu1 %vm534_vm0, %v522_v9 }
  0x6f   : > { %3344 = vmatprep.mubr.msk.f32.mxu1 %vm534_vm0, %v523_v10 }
  0x72   : > { %3345 = vmatmul.mubr.msk.f32.gmra.mrb[40].mxu1 %vm534_vm0, %v524_v11 }
  0x73   : > { %3347 = vmatprep.mubr.msk.f32.mxu1 %vm534_vm0, %v525_v12 }
  0x76   : > { %3348 = vmatmul.mubr.msk.f32.gmra.mrb[42].mxu1 %vm534_vm0, %v526_v13 }
  0x77   : > { %3350 = vmatprep.mubr.msk.f32.mxu1 %vm534_vm0, %v527_v14 }
  0x7a   : > { %3351 = vmatmul.mubr.msk.f32.gmra.mrb[44].mxu1 %vm534_vm0, %v528_v15 }
  0x7b   : > { %3353 = vmatprep.mubr.msk.f32.mxu1 %vm534_vm0, %v529_v16 }
  0x7e   : > { %3354 = vmatmul.mubr.msk.f32.gmra.mrb[46].mxu1 %vm534_vm0, %v530_v17 }
  0xf5   : > { %v4201_v42 = vpop.f32.mrb[0].mxu0  ;;  %v3286_v43 = vpop.f32.mrb[0].mxu1 }
  0xf6   : > { %v4204_v44 = vadd.f32 %v3286_v43, %v4201_v42  ;;  %v4206_v45 = vpop.f32.mrb[1].mxu0  ;;  %v1066_v46 = vpop.f32.mrb[1].mxu1 }
  0xf7   : > { %v4209_v47 = vadd.f32 %v1066_v46, %v4206_v45 }
  0xf9   : > { %v4211_v48 = vpop.f32.mrb[2].mxu0  ;;  %v3289_v49 = vpop.f32.mrb[2].mxu1 }
  0xfa   : > { %v4214_v50 = vadd.f32 %v3289_v49, %v4211_v48  ;;  %v4216_v51 = vpop.f32.mrb[3].mxu0  ;;  %v1076_v52 = vpop.f32.mrb[3].mxu1 }
  0xfb   : > { %v4219_v53 = vadd.f32 %v1076_v52, %v4216_v51 }
  0xfd   : > { %v4221_v54 = vpop.f32.mrb[4].mxu0  ;;  %v3292_v55 = vpop.f32.mrb[4].mxu1 }
  0xfe   : > { %v4224_v56 = vadd.f32 %v3292_v55, %v4221_v54  ;;  %v4226_v57 = vpop.f32.mrb[5].mxu0  ;;  %v1086_v58 = vpop.f32.mrb[5].mxu1  ;;  %v1977_v55 = vld [vmem:[%s4999_s7 + $0x10] sm:$0xff] }
  0xff   : > { %v4229_v59 = vadd.f32 %v1086_v58, %v4226_v57  ;;  %v1978_v58 = vld [vmem:[%s4999_s7 + $0x18] sm:$0xff] }
 0x101   : > { %v4231_v60 = vpop.f32.mrb[6].mxu0  ;;  %v3295_v61 = vpop.f32.mrb[6].mxu1 }
 0x102   : > { %v4234_v62 = vadd.f32 %v3295_v61, %v4231_v60  ;;  %v4236_v63 = vpop.f32.mrb[7].mxu0  ;;  %v1096_v0 = vpop.f32.mrb[7].mxu1 }
 0x103   : > { %v4239_v1 = vadd.f32 %v1096_v0, %v4236_v63 }
 0x105   : > { %v4241_v2 = vpop.f32.mrb[8].mxu0  ;;  %v3298_v3 = vpop.f32.mrb[8].mxu1 }
 0x106   : > { %v4244_v4 = vadd.f32 %v3298_v3, %v4241_v2  ;;  %v4246_v5 = vpop.f32.mrb[9].mxu0  ;;  %v1106_v6 = vpop.f32.mrb[9].mxu1 }
 0x107   : > { %v4249_v7 = vadd.f32 %v1106_v6, %v4246_v5  ;;  %v1979_v6 = vld [vmem:[%s4999_s7 + $0x20] sm:$0xff] }
 0x109   : > { %v4251_v8 = vpop.f32.mrb[10].mxu0  ;;  %v3301_v9 = vpop.f32.mrb[10].mxu1 }
 0x10a   : > { %v4254_v10 = vadd.f32 %v3301_v9, %v4251_v8  ;;  %v4256_v11 = vpop.f32.mrb[11].mxu0  ;;  %v1116_v12 = vpop.f32.mrb[11].mxu1  ;;  %v1980_v9 = vld [vmem:[%s4999_s7 + $0x28] sm:$0xff] }
 0x10b   : > { %v4259_v13 = vadd.f32 %v1116_v12, %v4256_v11 }
 0x10d   : > { %v4261_v14 = vpop.f32.mrb[12].mxu0  ;;  %v3304_v15 = vpop.f32.mrb[12].mxu1 }
 0x10e   : > { %v4264_v16 = vadd.f32 %v3304_v15, %v4261_v14  ;;  %v4266_v17 = vpop.f32.mrb[13].mxu0  ;;  %v1126_v18 = vpop.f32.mrb[13].mxu1 }
 0x10f   : > { %v4269_v19 = vadd.f32 %v1126_v18, %v4266_v17  ;;  %v3674_v18 = vpack.c.bf16 %v1978_v58, %v1977_v55 }
 0x111   : > { %v4271_v20 = vpop.f32.mrb[14].mxu0  ;;  %v3307_v21 = vpop.f32.mrb[14].mxu1  ;;  %3675 = vmatprep.subr.bf16.mxu1 %v3674_v18 }
 0x112   : > { %v4274_v22 = vadd.f32 %v3307_v21, %v4271_v20  ;;  %v4276_v23 = vpop.f32.mrb[15].mxu0  ;;  %v1136_v24 = vpop.f32.mrb[15].mxu1  ;;  %v3678_v21 = vpack.c.bf16 %v1980_v9, %v1979_v6  ;;  %3677 = vmatpush3.bf16.msra.mxu1 %v3674_v18 }
 0x113   : > { %v4279_v25 = vadd.f32 %v1136_v24, %v4276_v23 }
 0x114   : > { %3679 = vmatprep.subr.bf16.mxu1 %v3678_v21 }
 0x115   : > { %v3262_v26 = vpop.f32.mrb[16].mxu0  ;;  %v3310_v27 = vpop.f32.mrb[16].mxu1 }
 0x116   : > { %v1306_v28 = vadd.f32 %v3262_v26, %v4201_v42  ;;  %v4283_v29 = vadd.f32 %v3310_v27, %v4201_v42  ;;  %v986_v30 = vpop.f32.mrb[17].mxu0  ;;  %v1146_v31 = vpop.f32.mrb[17].mxu1  ;;  %3681 = vmatpush3.bf16.msra.mxu1 %v3678_v21 }
 0x117   : > { %v1305_v33 = vadd.f32 %v986_v30, %v4206_v45  ;;  %v4292_v34 = vadd.f32 %v1146_v31, %v4206_v45  ;;  %v1982_v30 = vld [vmem:[%s4999_s7 + $0x38] sm:$0xff]  ;;  %v2511_v31 = vld [vmem:[%s5001_s9] sm:$0xff] }
 0x118   : > { %v1376_v37 = vadd.f32 %v4288_v32, %v1306_v28  ;;  %v1981_v28 = vld [vmem:[%s4999_s7 + $0x30] sm:$0xff]  ;;  %3612 = vmatprep.subr.mxu0 %v2511_v31 }
 0x119   : > { %v1375_v39 = vadd.f32 %v4288_v32, %v1305_v33  ;;  %v3265_v40 = vpop.f32.mrb[18].mxu0  ;;  %v3313_v41 = vpop.f32.mrb[18].mxu1 }
 0x11a   : > { %v1308_v43 = vadd.f32 %v3265_v40, %v4211_v48  ;;  %v4304_v46 = vadd.f32 %v3313_v41, %v4211_v48  ;;  %v996_v49 = vpop.f32.mrb[19].mxu0  ;;  %v1156_v52 = vpop.f32.mrb[19].mxu1  ;;  %v1440_v12 = vmax.f32 %v1376_v37, 0.0 }
 0x11b   : > { %v1439_v61 = vmax.f32 %v1375_v39, 0.0  ;;  %v1307_v0 = vadd.f32 %v996_v49, %v4216_v51  ;;  %v4314_v3 = vadd.f32 %v1156_v52, %v4216_v51  ;;  %v3682_v49 = vpack.c.bf16 %v1982_v30, %v1981_v28 }
 0x11c   : > { %v1378_v15 = vadd.f32 %v4288_v32, %v1308_v43 }
 0x11d   : > { %v1377_v24 = vadd.f32 %v4288_v32, %v1307_v0  ;;  %v3268_v26 = vpop.f32.mrb[20].mxu0  ;;  %v3316_v27 = vpop.f32.mrb[20].mxu1  ;;  %3388 = vmatprep.mubr.f32.mxu0 %v1439_v61  ;;  %v1983_v61 = vld [vmem:[%s4999_s7 + $0x40] sm:$0xff]  ;;  %v1984_v0 = vld [vmem:[%s4999_s7 + $0x48] sm:$0xff]  ;;  %3683 = vmatprep.subr.bf16.mxu1 %v3682_v49 }
 0x11e   : > { %v1310_v33 = vadd.f32 %v3268_v26, %v4221_v54  ;;  %v4335_v35 = vadd.f32 %v3316_v27, %v4221_v54  ;;  %v1006_v36 = vpop.f32.mrb[21].mxu0  ;;  %v1166_v37 = vpop.f32.mrb[21].mxu1  ;;  %3389 = vmatmul.mubr.f32.vlgmr.msra.gmra.mrb[32].mxu0 %v1440_v12  ;;  %v1442_v41 = vmax.f32 %v1378_v15, 0.0  ;;  %v3686_v30 = vpack.c.bf16 %v1984_v0, %v1983_v61  ;;  %3685 = vmatpush3.bf16.msra.mxu1 %v3682_v49 }
 0x11f   : > { %v1441_v38 = vmax.f32 %v1377_v24, 0.0  ;;  %v1309_v39 = vadd.f32 %v1006_v36, %v4226_v57  ;;  %v4339_v40 = vadd.f32 %v1166_v37, %v4226_v57  ;;  %3613 = vmatpush3.msra.mxu0 %v2511_v31  ;;  %v1985_v37 = vld [vmem:[%s4999_s7 + $0x50] sm:$0xff] }
 0x120   : > { %v1380_v43 = vadd.f32 %v4288_v32, %v1310_v33  ;;  %3687 = vmatprep.subr.bf16.mxu1 %v3686_v30 }
 0x121   : > { %v1379_v52 = vadd.f32 %v4288_v32, %v1309_v39  ;;  %v3271_v55 = vpop.f32.mrb[22].mxu0  ;;  %v3319_v58 = vpop.f32.mrb[22].mxu1  ;;  %3391 = vmatprep.mubr.f32.mxu0 %v1441_v38  ;;  %v1986_v38 = vld [vmem:[%s4999_s7 + $0x58] sm:$0xff] }
 0x122   : > { %v1312_v6 = vadd.f32 %v3271_v55, %v4231_v60  ;;  %v4351_v9 = vadd.f32 %v3319_v58, %v4231_v60  ;;  %v1016_v12 = vpop.f32.mrb[23].mxu0  ;;  %v1176_v15 = vpop.f32.mrb[23].mxu1  ;;  %3392 = vmatmul.mubr.f32.gmra.mrb[34].mxu0 %v1442_v41  ;;  %v1444_v27 = vmax.f32 %v1380_v43, 0.0  ;;  %3689 = vmatpush3.bf16.msra.mxu1 %v3686_v30 }
 0x123   : > { %v1443_v18 = vmax.f32 %v1379_v52, 0.0  ;;  %v1311_v24 = vadd.f32 %v1016_v12, %v4236_v63  ;;  %v4355_v26 = vadd.f32 %v1176_v15, %v4236_v63 }
 0x124   : > { %v1382_v28 = vadd.f32 %v4288_v32, %v1312_v6  ;;  %v3690_v6 = vpack.c.bf16 %v1986_v38, %v1985_v37 }
 0x125   : > { %v1381_v31 = vadd.f32 %v4288_v32, %v1311_v24  ;;  %v3274_v33 = vpop.f32.mrb[24].mxu0  ;;  %v3322_v36 = vpop.f32.mrb[24].mxu1  ;;  %3394 = vmatprep.mubr.f32.mxu0 %v1443_v18  ;;  %v1987_v24 = vld [vmem:[%s4999_s7 + $0x60] sm:$0xff] }
 0x126   : > { %v1314_v21 = vadd.f32 %v3274_v33, %v4241_v2  ;;  %v4367_v39 = vadd.f32 %v3322_v36, %v4241_v2  ;;  %v1026_v41 = vpop.f32.mrb[25].mxu0  ;;  %v1186_v43 = vpop.f32.mrb[25].mxu1  ;;  %3395 = vmatmul.mubr.f32.gmra.mrb[36].mxu0 %v1444_v27  ;;  %v1446_v61 = vmax.f32 %v1382_v28, 0.0  ;;  %v1988_v27 = vld [vmem:[%s4999_s7 + $0x68] sm:$0xff]  ;;  %3691 = vmatprep.subr.bf16.mxu1 %v3690_v6 }
 0x127   : > { %v1445_v52 = vmax.f32 %v1381_v31, 0.0  ;;  %v1313_v55 = vadd.f32 %v1026_v41, %v4246_v5  ;;  %v4371_v58 = vadd.f32 %v1186_v43, %v4246_v5  ;;  %v3694_v43 = vpack.c.bf16 %v1988_v27, %v1987_v24  ;;  %3693 = vmatpush3.bf16.msra.mxu1 %v3690_v6 }
 0x128   : > { %v1384_v0 = vadd.f32 %v4288_v32, %v1314_v21 }
 0x129   : > { %v1383_v12 = vadd.f32 %v4288_v32, %v1313_v55  ;;  %v3277_v15 = vpop.f32.mrb[26].mxu0  ;;  %v3325_v18 = vpop.f32.mrb[26].mxu1  ;;  %3397 = vmatprep.mubr.f32.mxu0 %v1445_v52  ;;  %3695 = vmatprep.subr.bf16.mxu1 %v3694_v43 }
 0x12a   : > { %v1316_v49 = vadd.f32 %v3277_v15, %v4251_v8  ;;  %v4383_v28 = vadd.f32 %v3325_v18, %v4251_v8  ;;  %v1036_v31 = vpop.f32.mrb[27].mxu0  ;;  %v1196_v33 = vpop.f32.mrb[27].mxu1  ;;  %3398 = vmatmul.mubr.f32.gmra.mrb[38].mxu0 %v1446_v61  ;;  %v1448_v21 = vmax.f32 %v1384_v0, 0.0  ;;  %v1989_v61 = vld [vmem:[%s4999_s7 + $0x70] sm:$0xff] }
 0x12b   : > { %v1447_v36 = vmax.f32 %v1383_v12, 0.0  ;;  %v1315_v37 = vadd.f32 %v1036_v31, %v4256_v11  ;;  %v4387_v38 = vadd.f32 %v1196_v33, %v4256_v11  ;;  %v1990_v12 = vld [vmem:[%s4999_s7 + $0x78] sm:$0xff]  ;;  %3697 = vmatpush3.bf16.msra.mxu1 %v3694_v43  ;;  %v1392_v43 = vadd.f32 %v4288_v32, %v4204_v44 }
 0x12c   : > { %5008 = vst [vmem:[#allocation5_spill] sm:$0xff] %v4383_v28  ;;  %v1386_v41 = vadd.f32 %v4288_v32, %v1316_v49  ;;  %v1394_v44 = vadd.f32 %v4288_v32, %v4214_v50  ;;  %v1397_v50 = vadd.f32 %v4288_v32, %v4239_v1 }
 0x12d   : > { %v1385_v52 = vadd.f32 %v4288_v32, %v1315_v37  ;;  %v3280_v55 = vpop.f32.mrb[28].mxu0  ;;  %v3328_v15 = vpop.f32.mrb[28].mxu1  ;;  %3400 = vmatprep.mubr.f32.mxu0 %v1447_v36  ;;  %v3698_v37 = vpack.c.bf16 %v1990_v12, %v1989_v61 }
 0x12e   : > { %v1318_v30 = vadd.f32 %v3280_v55, %v4261_v14  ;;  %v4399_v0 = vadd.f32 %v3328_v15, %v4261_v14  ;;  %v1046_v18 = vpop.f32.mrb[29].mxu0  ;;  %v1206_v24 = vpop.f32.mrb[29].mxu1  ;;  %3401 = vmatmul.mubr.f32.gmra.mrb[40].mxu0 %v1448_v21  ;;  %v1450_v33 = vmax.f32 %v1386_v41, 0.0 }
 0x12f   : > { %v1449_v27 = vmax.f32 %v1385_v52, 0.0  ;;  %v1317_v49 = vadd.f32 %v1046_v18, %v4266_v17  ;;  %v4403_v31 = vadd.f32 %v1206_v24, %v4266_v17  ;;  %3699 = vmatprep.subr.bf16.mxu1 %v3698_v37 }
 0x130   : > { %5009 = vst [vmem:[#allocation6_spill] sm:$0xff] %v4399_v0  ;;  %v1388_v36 = vadd.f32 %v4288_v32, %v1318_v30  ;;  %3701 = vmatpush3.bf16.msra.mxu1 %v3698_v37 }
 0x131   : > { %v1387_v55 = vadd.f32 %v4288_v32, %v1317_v49  ;;  %v3283_v28 = vpop.f32.mrb[30].mxu0  ;;  %v3331_v15 = vpop.f32.mrb[30].mxu1  ;;  %3403 = vmatprep.mubr.f32.mxu0 %v1449_v27 }
 0x132   : > { %v1320_v0 = vadd.f32 %v3283_v28, %v4271_v20  ;;  %v4409_v21 = vadd.f32 %v3331_v15, %v4271_v20  ;;  %v1056_v52 = vpop.f32.mrb[31].mxu0  ;;  %v1216_v18 = vpop.f32.mrb[31].mxu1  ;;  %3404 = vmatmul.mubr.f32.gmra.mrb[42].mxu0 %v1450_v33  ;;  %v1452_v61 = vmax.f32 %v1388_v36, 0.0  ;;  %v1391_v28 = vadd.f32 %v4288_v32, %v4209_v47 }
 0x133   : > { %v1451_v24 = vmax.f32 %v1387_v55, 0.0  ;;  %v1319_v6 = vadd.f32 %v1056_v52, %v4276_v23  ;;  %v4413_v41 = vadd.f32 %v1216_v18, %v4276_v23  ;;  %v1393_v47 = vadd.f32 %v4288_v32, %v4219_v53 }
 0x134   : > { %v1390_v12 = vadd.f32 %v4288_v32, %v1320_v0  ;;  %v1455_v36 = vmax.f32 %v1391_v28, 0.0  ;;  %v1396_v28 = vadd.f32 %v4288_v32, %v4224_v56  ;;  %v1399_v56 = vadd.f32 %v4288_v32, %v4249_v7 }
 0x135   : > { %v1389_v30 = vadd.f32 %v4288_v32, %v1319_v6  ;;  %v3334_v27 = vpop.f32.mrb[32].mxu1  ;;  %3406 = vmatprep.mubr.f32.mxu0 %v1451_v24  ;;  %v1457_v37 = vmax.f32 %v1393_v47, 0.0  ;;  %v1395_v6 = vadd.f32 %v4288_v32, %v4229_v59  ;;  %v1400_v47 = vadd.f32 %v4288_v32, %v4244_v4 }
 0x136   : > { %v4420_v49 = vadd.f32 %v3334_v27, %v4201_v42  ;;  %v1226_v33 = vpop.f32.mrb[33].mxu1  ;;  %3407 = vmatmul.mubr.f32.gmra.mrb[44].mxu0 %v1452_v61  ;;  %v1454_v0 = vmax.f32 %v1390_v12, 0.0  ;;  %v1403_v4 = vadd.f32 %v4288_v32, %v4269_v19 }
 0x137   : > { %v1453_v55 = vmax.f32 %v1389_v30, 0.0  ;;  %v4423_v15 = vadd.f32 %v1226_v33, %v4206_v45  ;;  %v1456_v45 = vmax.f32 %v1392_v43, 0.0  ;;  %v1459_v30 = vmax.f32 %v1395_v6, 0.0 }
 0x138   : > { %v1461_v43 = vmax.f32 %v1397_v50, 0.0  ;;  %v1406_v50 = vadd.f32 %v4288_v32, %v4274_v22  ;;  %v1410_v22 = vadd.f32 %v4288_v32, %v4304_v46  ;;  %v1414_v46 = vadd.f32 %v4288_v32, %v4351_v9 }
 0x139   : > { %v3337_v52 = vpop.f32.mrb[34].mxu1  ;;  %3409 = vmatprep.mubr.f32.mxu0 %v1453_v55  ;;  %v1398_v55 = vadd.f32 %v4288_v32, %v4234_v62  ;;  %v1401_v62 = vadd.f32 %v4288_v32, %v4259_v13 }
 0x13a   : > { %v4430_v42 = vadd.f32 %v3337_v52, %v4211_v48  ;;  %v1236_v18 = vpop.f32.mrb[35].mxu1  ;;  %3410 = vmatmul.mubr.f32.gmra.mrb[46].mxu0 %v1454_v0  ;;  %v1463_v52 = vmax.f32 %v1399_v56, 0.0 }
 0x13b   : > { %v4433_v24 = vadd.f32 %v1236_v18, %v4216_v51  ;;  %3412 = vmatprep.mubr.f32.mxu0 %v1455_v36  ;;  %v1458_v51 = vmax.f32 %v1394_v44, 0.0  ;;  %v1402_v44 = vadd.f32 %v4288_v32, %v4254_v10  ;;  %v1405_v10 = vadd.f32 %v4288_v32, %v4279_v25 }
 0x13c   : > { %v1470_v25 = vmax.f32 %v1406_v50, 0.0 }
 0x13d   : > { %v3340_v53 = vpop.f32.mrb[36].mxu1 }
 0x13e   : > { %v4440_v61 = vadd.f32 %v3340_v53, %v4221_v54  ;;  %v1246_v48 = vpop.f32.mrb[37].mxu1  ;;  %3413 = vmatmul.mubr.f32.gmra.mrb[48].mxu0 %v1456_v45 }
 0x13f   : > { %v4443_v12 = vadd.f32 %v1246_v48, %v4226_v57  ;;  %3415 = vmatprep.mubr.f32.mxu0 %v1457_v37  ;;  %v1460_v57 = vmax.f32 %v1396_v28, 0.0  ;;  %v1465_v37 = vmax.f32 %v1401_v62, 0.0  ;;  %v1404_v48 = vadd.f32 %v4288_v32, %v4264_v16  ;;  %v5010_v62 = vld [vmem:[#allocation5_spill] sm:$0xff] }
 0x140   : > { %v1407_v16 = vadd.f32 %v4288_v32, %v4292_v34  ;;  %v1411_v34 = vadd.f32 %v4288_v32, %v4339_v40  ;;  %v1415_v40 = vadd.f32 %v4288_v32, %v4371_v58  ;;  %v1418_v9 = vadd.f32 %v4288_v32, %v5010_v62 }
 0x141   : > { %v3343_v27 = vpop.f32.mrb[38].mxu1  ;;  %v1419_v58 = vadd.f32 %v4288_v32, %v4403_v31  ;;  %v1423_v31 = vadd.f32 %v4288_v32, %v4423_v15  ;;  %v1427_v15 = vadd.f32 %v4288_v32, %v4443_v12 }
 0x142   : > { %v4450_v59 = vadd.f32 %v3343_v27, %v4231_v60  ;;  %v1256_v54 = vpop.f32.mrb[39].mxu1  ;;  %3416 = vmatmul.mubr.f32.gmra.mrb[50].mxu0 %v1458_v51  ;;  %v1467_v51 = vmax.f32 %v1403_v4, 0.0  ;;  %v1469_v27 = vmax.f32 %v1405_v10, 0.0  ;;  %v1475_v56 = vmax.f32 %v1411_v34, 0.0  ;;  %v3766_v34 = vld [vmem:[%s3991_s14 + $0x28] sm:$0xff] }
 0x143   : > { %v4453_v33 = vadd.f32 %v1256_v54, %v4236_v63  ;;  %3418 = vmatprep.mubr.f32.mxu0 %v1459_v30  ;;  %v1462_v63 = vmax.f32 %v1398_v55, 0.0  ;;  %v1471_v54 = vmax.f32 %v1407_v16, 0.0  ;;  %v1422_v4 = vadd.f32 %v4288_v32, %v4409_v21 }
 0x144   : > { %v1426_v21 = vadd.f32 %v4288_v32, %v4430_v42  ;;  %v1430_v42 = vadd.f32 %v4288_v32, %v4450_v59 }
 0x145   : > { %v3346_v0 = vpop.f32.mrb[40].mxu1 }
 0x146   : > { %v4460_v1 = vadd.f32 %v3346_v0, %v4241_v2  ;;  %v1266_v60 = vpop.f32.mrb[41].mxu1  ;;  %3419 = vmatmul.mubr.f32.gmra.mrb[52].mxu0 %v1460_v57 }
 0x147   : > { %v4463_v36 = vadd.f32 %v1266_v60, %v4246_v5  ;;  %3421 = vmatprep.mubr.f32.mxu0 %v1461_v43  ;;  %v1464_v5 = vmax.f32 %v1400_v47, 0.0  ;;  %v1474_v43 = vmax.f32 %v1410_v22, 0.0  ;;  %v1479_v47 = vmax.f32 %v1415_v40, 0.0  ;;  %v3774_v40 = vld [vmem:[%s3991_s14 + $0x68] sm:$0xff] }
 0x149   : > { %v3349_v18 = vpop.f32.mrb[42].mxu1  ;;  %v1431_v12 = vadd.f32 %v4288_v32, %v4463_v36 }
 0x14a   : > { %v4470_v7 = vadd.f32 %v3349_v18, %v4251_v8  ;;  %v1276_v2 = vpop.f32.mrb[43].mxu1  ;;  %3422 = vmatmul.mubr.f32.gmra.mrb[54].mxu0 %v1462_v63  ;;  %v1478_v63 = vmax.f32 %v1414_v46, 0.0  ;;  %v3772_v46 = vld [vmem:[%s3991_s14 + $0x58] sm:$0xff] }
 0x14b   : > { %v4473_v45 = vadd.f32 %v1276_v2, %v4256_v11  ;;  %3424 = vmatprep.mubr.f32.mxu0 %v1463_v52  ;;  %v1466_v11 = vmax.f32 %v1402_v44, 0.0  ;;  %v1482_v2 = vmax.f32 %v1418_v9, 0.0  ;;  %v1483_v44 = vmax.f32 %v1419_v58, 0.0 }
 0x14c   : > { %v1495_v16 = vmax.f32 %v1431_v12, 0.0  ;;  %v1434_v59 = vadd.f32 %v4288_v32, %v4470_v7 }
 0x14d   : > { %v3352_v6 = vpop.f32.mrb[44].mxu1 }
 0x14e   : > { %v4480_v13 = vadd.f32 %v3352_v6, %v4261_v14  ;;  %v1286_v8 = vpop.f32.mrb[45].mxu1  ;;  %3425 = vmatmul.mubr.f32.gmra.mrb[56].mxu0 %v1464_v5  ;;  %v5011_v5 = vld [vmem:[#allocation6_spill] sm:$0xff] }
 0x14f   : > { %v4483_v53 = vadd.f32 %v1286_v8, %v4266_v17  ;;  %3427 = vmatprep.mubr.f32.mxu0 %v1465_v37  ;;  %v1468_v17 = vmax.f32 %v1404_v48, 0.0  ;;  %v1486_v8 = vmax.f32 %v1422_v4, 0.0  ;;  %v1487_v48 = vmax.f32 %v1423_v31, 0.0 }
 0x151   : > { %v3355_v28 = vpop.f32.mrb[46].mxu1  ;;  %v1435_v36 = vadd.f32 %v4288_v32, %v4483_v53 }
 0x152   : > { %v4490_v19 = vadd.f32 %v3355_v28, %v4271_v20  ;;  %v1296_v14 = vpop.f32.mrb[47].mxu1  ;;  %3428 = vmatmul.mubr.f32.gmra.mrb[58].mxu0 %v1466_v11  ;;  %v1408_v20 = vadd.f32 %v4288_v32, %v4283_v29  ;;  %v1412_v29 = vadd.f32 %v4288_v32, %v4335_v35  ;;  %v1416_v35 = vadd.f32 %v4288_v32, %v4367_v39 }
 0x153   : > { %v4493_v30 = vadd.f32 %v1296_v14, %v4276_v23  ;;  %3430 = vmatprep.mubr.f32.mxu0 %v1467_v51  ;;  %v1409_v23 = vadd.f32 %v4288_v32, %v4314_v3  ;;  %v1413_v3 = vadd.f32 %v4288_v32, %v4355_v26  ;;  %v1417_v26 = vadd.f32 %v4288_v32, %v4387_v38 }
 0x154   : > { %v1472_v57 = vmax.f32 %v1408_v20, 0.0  ;;  %v1476_v0 = vmax.f32 %v1412_v29, 0.0  ;;  %v1480_v52 = vmax.f32 %v1416_v35, 0.0  ;;  %v1420_v39 = vadd.f32 %v4288_v32, %v5011_v5  ;;  %v3768_v29 = vld [vmem:[%s3991_s14 + $0x38] sm:$0xff] }
 0x155   : > { %v1473_v55 = vmax.f32 %v1409_v23, 0.0  ;;  %v1477_v60 = vmax.f32 %v1413_v3, 0.0  ;;  %v1481_v18 = vmax.f32 %v1417_v26, 0.0  ;;  %v1421_v38 = vadd.f32 %v4288_v32, %v4413_v41  ;;  %v3770_v3 = vld [vmem:[%s3991_s14 + $0x48] sm:$0xff]  ;;  %v3776_v35 = vld [vmem:[%s3991_s14 + $0x78] sm:$0xff] }
 0x156   : > { %3431 = vmatmul.mubr.f32.gmra.mrb[60].mxu0 %v1468_v17  ;;  %v1484_v37 = vmax.f32 %v1420_v39, 0.0  ;;  %v1424_v11 = vadd.f32 %v4288_v32, %v4420_v49  ;;  %v1425_v41 = vadd.f32 %v4288_v32, %v4433_v24  ;;  %v1490_v28 = vmax.f32 %v1426_v21, 0.0 }
 0x157   : > { %3433 = vmatprep.mubr.f32.mxu0 %v1469_v27  ;;  %v1485_v6 = vmax.f32 %v1421_v38, 0.0  ;;  %v1428_v49 = vadd.f32 %v4288_v32, %v4440_v61  ;;  %v1491_v14 = vmax.f32 %v1427_v15, 0.0  ;;  %v1429_v24 = vadd.f32 %v4288_v32, %v4453_v33 }
 0x158   : > { %v1488_v51 = vmax.f32 %v1424_v11, 0.0  ;;  %v1489_v10 = vmax.f32 %v1425_v41, 0.0  ;;  %v1494_v27 = vmax.f32 %v1430_v42, 0.0  ;;  %v1432_v61 = vadd.f32 %v4288_v32, %v4460_v1 }
 0x159   : > { %v1492_v17 = vmax.f32 %v1428_v49, 0.0  ;;  %v1493_v50 = vmax.f32 %v1429_v24, 0.0  ;;  %v1433_v33 = vadd.f32 %v4288_v32, %v4473_v45  ;;  %v1436_v1 = vadd.f32 %v4288_v32, %v4480_v13  ;;  %v3761_v13 = vld [vmem:[%s3991_s14] sm:$0xff] }
 0x15a   : > { %3434 = vmatmul.mubr.f32.gmra.mrb[62].mxu0 %v1470_v25  ;;  %v1496_v25 = vmax.f32 %v1432_v61, 0.0  ;;  %v1499_v45 = vmax.f32 %v1435_v36, 0.0  ;;  %v1437_v23 = vadd.f32 %v4288_v32, %v4493_v30  ;;  %v1438_v53 = vadd.f32 %v4288_v32, %v4490_v19  ;;  %v3762_v30 = vld [vmem:[%s3991_s14 + $0x8] sm:$0xff]  ;;  %v3764_v32 = vld [vmem:[%s3991_s14 + $0x18] sm:$0xff]  ;;  %v3765_v19 = vld [vmem:[%s3991_s14 + $0x20] sm:$0xff] }
 0x15b   : > { %3436 = vmatprep.mubr.f32.mxu0 %v1471_v54  ;;  %v1497_v20 = vmax.f32 %v1433_v33, 0.0  ;;  %v1498_v54 = vmax.f32 %v1434_v59, 0.0  ;;  %v1500_v7 = vmax.f32 %v1436_v1, 0.0 }
 0x15c   : > { %v1502_v22 = vmax.f32 %v1438_v53, 0.0 }
 0x15e   : > { %3437 = vmatmul.mubr.f32.gmra.mrb[64].mxu0 %v1472_v57  ;;  %v1501_v57 = vmax.f32 %v1437_v23, 0.0 }
 0x15f   : > { %3439 = vmatprep.mubr.f32.mxu0 %v1473_v55  ;;  %v3763_v55 = vld [vmem:[%s3991_s14 + $0x10] sm:$0xff] }
 0x162   : > { %3440 = vmatmul.mubr.f32.gmra.mrb[66].mxu0 %v1474_v43  ;;  %v3767_v43 = vld [vmem:[%s3991_s14 + $0x30] sm:$0xff] }
 0x163   : > { %3442 = vmatprep.mubr.f32.mxu0 %v1475_v56  ;;  %v3769_v56 = vld [vmem:[%s3991_s14 + $0x40] sm:$0xff] }
 0x166   : > { %3443 = vmatmul.mubr.f32.gmra.mrb[68].mxu0 %v1476_v0  ;;  %v3771_v0 = vld [vmem:[%s3991_s14 + $0x50] sm:$0xff] }
 0x167   : > { %3445 = vmatprep.mubr.f32.mxu0 %v1477_v60  ;;  %v3773_v60 = vld [vmem:[%s3991_s14 + $0x60] sm:$0xff] }
 0x16a   : > { %3446 = vmatmul.mubr.f32.gmra.mrb[70].mxu0 %v1478_v63  ;;  %v3775_v63 = vld [vmem:[%s3991_s14 + $0x70] sm:$0xff] }
 0x16b   : > { %3448 = vmatprep.mubr.f32.mxu0 %v1479_v47  ;;  %v4596_v47 = vld [vmem:[%s4998_s6] ss:$0 sm:$0xff] }
 0x16e   : > { %3449 = vmatmul.mubr.f32.gmra.mrb[72].mxu0 %v1480_v52 }
 0x16f   : > { %3451 = vmatprep.mubr.f32.mxu0 %v1481_v18 }
 0x172   : > { %3452 = vmatmul.mubr.f32.gmra.mrb[74].mxu0 %v1482_v2 }
 0x173   : > { %3454 = vmatprep.mubr.f32.mxu0 %v1483_v44 }
 0x176   : > { %3455 = vmatmul.mubr.f32.gmra.mrb[76].mxu0 %v1484_v37 }
 0x177   : > { %3457 = vmatprep.mubr.f32.mxu0 %v1485_v6 }
 0x17a   : > { %3458 = vmatmul.mubr.f32.gmra.mrb[78].mxu0 %v1486_v8 }
 0x17b   : > { %3460 = vmatprep.mubr.f32.mxu0 %v1487_v48 }
 0x17e   : > { %3461 = vmatmul.mubr.f32.gmra.mrb[80].mxu0 %v1488_v51 }
 0x17f   : > { %3463 = vmatprep.mubr.f32.mxu0 %v1489_v10 }
 0x182   : > { %3464 = vmatmul.mubr.f32.gmra.mrb[82].mxu0 %v1490_v28 }
 0x183   : > { %3466 = vmatprep.mubr.f32.mxu0 %v1491_v14 }
 0x186   : > { %3467 = vmatmul.mubr.f32.gmra.mrb[84].mxu0 %v1492_v17 }
 0x187   : > { %3469 = vmatprep.mubr.f32.mxu0 %v1493_v50 }
 0x18a   : > { %3470 = vmatmul.mubr.f32.gmra.mrb[86].mxu0 %v1494_v27 }
 0x18b   : > { %3472 = vmatprep.mubr.f32.mxu0 %v1495_v16 }
 0x18e   : > { %3473 = vmatmul.mubr.f32.gmra.mrb[88].mxu0 %v1496_v25 }
 0x18f   : > { %3475 = vmatprep.mubr.f32.mxu0 %v1497_v20 }
 0x192   : > { %3476 = vmatmul.mubr.f32.gmra.mrb[90].mxu0 %v1498_v54 }
 0x193   : > { %3478 = vmatprep.mubr.f32.mxu0 %v1499_v45 }
 0x196   : > { %3479 = vmatmul.mubr.f32.gmra.mrb[92].mxu0 %v1500_v7 }
 0x197   : > { %3481 = vmatprep.mubr.f32.mxu0 %v1501_v57 }
 0x19a   : > { %3482 = vmatmul.mubr.f32.gmra.mrb[94].mxu0 %v1502_v22 }
 0x19b   : > { %3614 = vmatprep.mubr.msk.f32.mxu0 %vm534_vm0, %v3761_v13 }
 0x19e   : > { %3615 = vmatmul.mubr.msk.f32.vlgmr.msra.gmra.mrb[96].mxu0 %vm534_vm0, %v3762_v30 }
 0x19f   : > { %3617 = vmatprep.mubr.msk.f32.mxu0 %vm534_vm0, %v3763_v55 }
 0x1a2   : > { %3618 = vmatmul.mubr.msk.f32.gmra.mrb[98].mxu0 %vm534_vm0, %v3764_v32 }
 0x1a3   : > { %3620 = vmatprep.mubr.msk.f32.mxu0 %vm534_vm0, %v3765_v19 }
 0x1a6   : > { %3621 = vmatmul.mubr.msk.f32.gmra.mrb[100].mxu0 %vm534_vm0, %v3766_v34 }
 0x1a7   : > { %3623 = vmatprep.mubr.msk.f32.mxu0 %vm534_vm0, %v3767_v43 }
 0x1aa   : > { %3624 = vmatmul.mubr.msk.f32.gmra.mrb[102].mxu0 %vm534_vm0, %v3768_v29 }
 0x1ab   : > { %3626 = vmatprep.mubr.msk.f32.mxu0 %vm534_vm0, %v3769_v56 }
 0x1ae   : > { %3627 = vmatmul.mubr.msk.f32.gmra.mrb[104].mxu0 %vm534_vm0, %v3770_v3 }
 0x1af   : > { %3629 = vmatprep.mubr.msk.f32.mxu0 %vm534_vm0, %v3771_v0 }
 0x1b2   : > { %3630 = vmatmul.mubr.msk.f32.gmra.mrb[106].mxu0 %vm534_vm0, %v3772_v46 }
 0x1b3   : > { %3632 = vmatprep.mubr.msk.f32.mxu0 %vm534_vm0, %v3773_v60 }
 0x1b6   : > { %3633 = vmatmul.mubr.msk.f32.gmra.mrb[108].mxu0 %vm534_vm0, %v3774_v40 }
 0x1b7   : > { %3635 = vmatprep.mubr.msk.f32.mxu0 %vm534_vm0, %v3775_v63 }
 0x1ba   : > { %3636 = vmatmul.mubr.msk.f32.gmra.mrb[110].mxu0 %vm534_vm0, %v3776_v35 }
 0x1f1   : > { %v3390_v26 = vpop.f32.mrb[32].mxu0 }
 0x1f2   : > { %v1598_v52 = vadd.f32 %v3390_v26, %v4596_v47  ;;  %v1592_v62 = vpop.f32.mrb[33].mxu0 }
 0x1f3   : > { %v1593_v9 = vadd.f32 %v4596_v47, %v1592_v62 }
 0x1f4   : > { %v1912_v2 = vmax.f32 %v1598_v52, 0.0 }
 0x1f5   : > { %v1911_v18 = vmax.f32 %v1593_v9, 0.0  ;;  %v3393_v58 = vpop.f32.mrb[34].mxu0 }
 0x1f6   : > { %v1608_v5 = vadd.f32 %v3393_v58, %v4596_v47  ;;  %v1602_v39 = vpop.f32.mrb[35].mxu0 }
 0x1f7   : > { %v1603_v44 = vadd.f32 %v4596_v47, %v1602_v39  ;;  %3516 = vmatprep.mubr.f32.mxu1 %v1911_v18 }
 0x1f8   : > { %3517 = vmatmul.mubr.f32.vlgmr.msra.gmra.mrb[48].mxu1 %v1912_v2  ;;  %v1914_v4 = vmax.f32 %v1608_v5, 0.0 }
 0x1f9   : > { %v1913_v38 = vmax.f32 %v1603_v44, 0.0  ;;  %v3396_v37 = vpop.f32.mrb[36].mxu0 }
 0x1fa   : > { %v1618_v6 = vadd.f32 %v3396_v37, %v4596_v47  ;;  %v1612_v31 = vpop.f32.mrb[37].mxu0 }
 0x1fb   : > { %v1613_v8 = vadd.f32 %v4596_v47, %v1612_v31  ;;  %3519 = vmatprep.mubr.f32.mxu1 %v1913_v38 }
 0x1fc   : > { %3520 = vmatmul.mubr.f32.gmra.mrb[50].mxu1 %v1914_v4  ;;  %v1916_v41 = vmax.f32 %v1618_v6, 0.0 }
 0x1fd   : > { %v1915_v11 = vmax.f32 %v1613_v8, 0.0  ;;  %v3399_v48 = vpop.f32.mrb[38].mxu0 }
 0x1fe   : > { %v1628_v51 = vadd.f32 %v3399_v48, %v4596_v47  ;;  %v1622_v21 = vpop.f32.mrb[39].mxu0 }
 0x1ff   : > { %v1623_v10 = vadd.f32 %v4596_v47, %v1622_v21  ;;  %3522 = vmatprep.mubr.f32.mxu1 %v1915_v11 }
 0x200   : > { %3523 = vmatmul.mubr.f32.gmra.mrb[52].mxu1 %v1916_v41  ;;  %v1918_v49 = vmax.f32 %v1628_v51, 0.0 }
 0x201   : > { %v1917_v15 = vmax.f32 %v1623_v10, 0.0  ;;  %v3402_v28 = vpop.f32.mrb[40].mxu0 }
 0x202   : > { %v1638_v14 = vadd.f32 %v3402_v28, %v4596_v47  ;;  %v1632_v24 = vpop.f32.mrb[41].mxu0 }
 0x203   : > { %v1633_v17 = vadd.f32 %v4596_v47, %v1632_v24  ;;  %3525 = vmatprep.mubr.f32.mxu1 %v1917_v15 }
 0x204   : > { %3526 = vmatmul.mubr.f32.gmra.mrb[54].mxu1 %v1918_v49  ;;  %v1920_v12 = vmax.f32 %v1638_v14, 0.0 }
 0x205   : > { %v1919_v42 = vmax.f32 %v1633_v17, 0.0  ;;  %v3405_v50 = vpop.f32.mrb[42].mxu0 }
 0x206   : > { %v1648_v27 = vadd.f32 %v3405_v50, %v4596_v47  ;;  %v1642_v61 = vpop.f32.mrb[43].mxu0 }
 0x207   : > { %v1643_v16 = vadd.f32 %v4596_v47, %v1642_v61  ;;  %3528 = vmatprep.mubr.f32.mxu1 %v1919_v42 }
 0x208   : > { %3529 = vmatmul.mubr.f32.gmra.mrb[56].mxu1 %v1920_v12  ;;  %v1922_v59 = vmax.f32 %v1648_v27, 0.0 }
 0x209   : > { %v1921_v33 = vmax.f32 %v1643_v16, 0.0  ;;  %v3408_v25 = vpop.f32.mrb[44].mxu0 }
 0x20a   : > { %v1658_v20 = vadd.f32 %v3408_v25, %v4596_v47  ;;  %v1652_v36 = vpop.f32.mrb[45].mxu0 }
 0x20b   : > { %v1653_v54 = vadd.f32 %v4596_v47, %v1652_v36  ;;  %3531 = vmatprep.mubr.f32.mxu1 %v1921_v33 }
 0x20c   : > { %3532 = vmatmul.mubr.f32.gmra.mrb[58].mxu1 %v1922_v59  ;;  %v1924_v23 = vmax.f32 %v1658_v20, 0.0 }
 0x20d   : > { %v1923_v1 = vmax.f32 %v1653_v54, 0.0  ;;  %v3411_v45 = vpop.f32.mrb[46].mxu0 }
 0x20e   : > { %v1668_v7 = vadd.f32 %v3411_v45, %v4596_v47  ;;  %v1662_v53 = vpop.f32.mrb[47].mxu0 }
 0x20f   : > { %v1663_v57 = vadd.f32 %v4596_v47, %v1662_v53  ;;  %3534 = vmatprep.mubr.f32.mxu1 %v1923_v1 }
 0x210   : > { %3535 = vmatmul.mubr.f32.gmra.mrb[60].mxu1 %v1924_v23  ;;  %v1926_v30 = vmax.f32 %v1668_v7, 0.0 }
 0x211   : > { %v1925_v22 = vmax.f32 %v1663_v57, 0.0  ;;  %v3414_v13 = vpop.f32.mrb[48].mxu0 }
 0x212   : > { %v1678_v55 = vadd.f32 %v3414_v13, %v4596_v47  ;;  %v1672_v32 = vpop.f32.mrb[49].mxu0 }
 0x213   : > { %v1673_v19 = vadd.f32 %v4596_v47, %v1672_v32  ;;  %3537 = vmatprep.mubr.f32.mxu1 %v1925_v22 }
 0x214   : > { %3538 = vmatmul.mubr.f32.gmra.mrb[62].mxu1 %v1926_v30  ;;  %v1928_v29 = vmax.f32 %v1678_v55, 0.0 }
 0x215   : > { %v1927_v34 = vmax.f32 %v1673_v19, 0.0  ;;  %v3417_v43 = vpop.f32.mrb[50].mxu0 }
 0x216   : > { %v1688_v56 = vadd.f32 %v3417_v43, %v4596_v47  ;;  %v1682_v3 = vpop.f32.mrb[51].mxu0 }
 0x217   : > { %v1683_v0 = vadd.f32 %v4596_v47, %v1682_v3  ;;  %3540 = vmatprep.mubr.f32.mxu1 %v1927_v34 }
 0x218   : > { %3541 = vmatmul.mubr.f32.gmra.mrb[64].mxu1 %v1928_v29  ;;  %v1930_v40 = vmax.f32 %v1688_v56, 0.0 }
 0x219   : > { %v1929_v46 = vmax.f32 %v1683_v0, 0.0  ;;  %v3420_v60 = vpop.f32.mrb[52].mxu0 }
 0x21a   : > { %v1698_v63 = vadd.f32 %v3420_v60, %v4596_v47  ;;  %v1692_v35 = vpop.f32.mrb[53].mxu0 }
 0x21b   : > { %v1693_v26 = vadd.f32 %v4596_v47, %v1692_v35  ;;  %3543 = vmatprep.mubr.f32.mxu1 %v1929_v46 }
 0x21c   : > { %3544 = vmatmul.mubr.f32.gmra.mrb[66].mxu1 %v1930_v40  ;;  %v1932_v9 = vmax.f32 %v1698_v63, 0.0 }
 0x21d   : > { %v1931_v52 = vmax.f32 %v1693_v26, 0.0  ;;  %v3423_v62 = vpop.f32.mrb[54].mxu0 }
 0x21e   : > { %v1708_v18 = vadd.f32 %v3423_v62, %v4596_v47  ;;  %v1702_v58 = vpop.f32.mrb[55].mxu0 }
 0x21f   : > { %v1703_v2 = vadd.f32 %v4596_v47, %v1702_v58  ;;  %3546 = vmatprep.mubr.f32.mxu1 %v1931_v52 }
 0x220   : > { %3547 = vmatmul.mubr.f32.gmra.mrb[68].mxu1 %v1932_v9  ;;  %v1934_v44 = vmax.f32 %v1708_v18, 0.0 }
 0x221   : > { %v1933_v5 = vmax.f32 %v1703_v2, 0.0  ;;  %v3426_v39 = vpop.f32.mrb[56].mxu0 }
 0x222   : > { %v1718_v38 = vadd.f32 %v3426_v39, %v4596_v47  ;;  %v1712_v37 = vpop.f32.mrb[57].mxu0 }
 0x223   : > { %v1713_v4 = vadd.f32 %v4596_v47, %v1712_v37  ;;  %3549 = vmatprep.mubr.f32.mxu1 %v1933_v5 }
 0x224   : > { %3550 = vmatmul.mubr.f32.gmra.mrb[70].mxu1 %v1934_v44  ;;  %v1936_v8 = vmax.f32 %v1718_v38, 0.0 }
 0x225   : > { %v1935_v6 = vmax.f32 %v1713_v4, 0.0  ;;  %v3429_v31 = vpop.f32.mrb[58].mxu0 }
 0x226   : > { %v1728_v11 = vadd.f32 %v3429_v31, %v4596_v47  ;;  %v1722_v48 = vpop.f32.mrb[59].mxu0 }
 0x227   : > { %v1723_v41 = vadd.f32 %v4596_v47, %v1722_v48  ;;  %3552 = vmatprep.mubr.f32.mxu1 %v1935_v6 }
 0x228   : > { %3553 = vmatmul.mubr.f32.gmra.mrb[72].mxu1 %v1936_v8  ;;  %v1938_v10 = vmax.f32 %v1728_v11, 0.0 }
 0x229   : > { %v1937_v51 = vmax.f32 %v1723_v41, 0.0  ;;  %v3432_v21 = vpop.f32.mrb[60].mxu0 }
 0x22a   : > { %v1738_v15 = vadd.f32 %v3432_v21, %v4596_v47  ;;  %v1732_v28 = vpop.f32.mrb[61].mxu0 }
 0x22b   : > { %v1733_v49 = vadd.f32 %v4596_v47, %v1732_v28  ;;  %3555 = vmatprep.mubr.f32.mxu1 %v1937_v51 }
 0x22c   : > { %3556 = vmatmul.mubr.f32.gmra.mrb[74].mxu1 %v1938_v10  ;;  %v1940_v17 = vmax.f32 %v1738_v15, 0.0 }
 0x22d   : > { %v1939_v14 = vmax.f32 %v1733_v49, 0.0  ;;  %v3435_v24 = vpop.f32.mrb[62].mxu0 }
 0x22e   : > { %v1748_v42 = vadd.f32 %v3435_v24, %v4596_v47  ;;  %v1742_v50 = vpop.f32.mrb[63].mxu0 }
 0x22f   : > { %v1743_v12 = vadd.f32 %v4596_v47, %v1742_v50  ;;  %3558 = vmatprep.mubr.f32.mxu1 %v1939_v14 }
 0x230   : > { %3559 = vmatmul.mubr.f32.gmra.mrb[76].mxu1 %v1940_v17  ;;  %v1942_v16 = vmax.f32 %v1748_v42, 0.0 }
 0x231   : > { %v1941_v27 = vmax.f32 %v1743_v12, 0.0  ;;  %v3438_v61 = vpop.f32.mrb[64].mxu0 }
 0x232   : > { %v1758_v33 = vadd.f32 %v3438_v61, %v4596_v47  ;;  %v1752_v25 = vpop.f32.mrb[65].mxu0 }
 0x233   : > { %v1753_v59 = vadd.f32 %v4596_v47, %v1752_v25  ;;  %3561 = vmatprep.mubr.f32.mxu1 %v1941_v27 }
 0x234   : > { %3562 = vmatmul.mubr.f32.gmra.mrb[78].mxu1 %v1942_v16  ;;  %v1944_v54 = vmax.f32 %v1758_v33, 0.0 }
 0x235   : > { %v1943_v20 = vmax.f32 %v1753_v59, 0.0  ;;  %v3441_v36 = vpop.f32.mrb[66].mxu0 }
 0x236   : > { %v1768_v1 = vadd.f32 %v3441_v36, %v4596_v47  ;;  %v1762_v45 = vpop.f32.mrb[67].mxu0 }
 0x237   : > { %v1763_v23 = vadd.f32 %v4596_v47, %v1762_v45  ;;  %3564 = vmatprep.mubr.f32.mxu1 %v1943_v20 }
 0x238   : > { %3565 = vmatmul.mubr.f32.gmra.mrb[80].mxu1 %v1944_v54  ;;  %v1946_v57 = vmax.f32 %v1768_v1, 0.0 }
 0x239   : > { %v1945_v7 = vmax.f32 %v1763_v23, 0.0  ;;  %v3444_v53 = vpop.f32.mrb[68].mxu0 }
 0x23a   : > { %v1778_v22 = vadd.f32 %v3444_v53, %v4596_v47  ;;  %v1772_v13 = vpop.f32.mrb[69].mxu0 }
 0x23b   : > { %v1773_v30 = vadd.f32 %v4596_v47, %v1772_v13  ;;  %3567 = vmatprep.mubr.f32.mxu1 %v1945_v7 }
 0x23c   : > { %3568 = vmatmul.mubr.f32.gmra.mrb[82].mxu1 %v1946_v57  ;;  %v1948_v19 = vmax.f32 %v1778_v22, 0.0 }
 0x23d   : > { %v1947_v55 = vmax.f32 %v1773_v30, 0.0  ;;  %v3447_v32 = vpop.f32.mrb[70].mxu0 }
 0x23e   : > { %v1788_v34 = vadd.f32 %v3447_v32, %v4596_v47  ;;  %v1782_v43 = vpop.f32.mrb[71].mxu0 }
 0x23f   : > { %v1783_v29 = vadd.f32 %v4596_v47, %v1782_v43  ;;  %3570 = vmatprep.mubr.f32.mxu1 %v1947_v55 }
 0x240   : > { %3571 = vmatmul.mubr.f32.gmra.mrb[84].mxu1 %v1948_v19  ;;  %v1950_v0 = vmax.f32 %v1788_v34, 0.0 }
 0x241   : > { %v1949_v56 = vmax.f32 %v1783_v29, 0.0  ;;  %v3450_v3 = vpop.f32.mrb[72].mxu0 }
 0x242   : > { %v1798_v46 = vadd.f32 %v3450_v3, %v4596_v47  ;;  %v1792_v60 = vpop.f32.mrb[73].mxu0 }
 0x243   : > { %v1793_v40 = vadd.f32 %v4596_v47, %v1792_v60  ;;  %3573 = vmatprep.mubr.f32.mxu1 %v1949_v56 }
 0x244   : > { %3574 = vmatmul.mubr.f32.gmra.mrb[86].mxu1 %v1950_v0  ;;  %v1952_v26 = vmax.f32 %v1798_v46, 0.0 }
 0x245   : > { %v1951_v63 = vmax.f32 %v1793_v40, 0.0  ;;  %v3453_v35 = vpop.f32.mrb[74].mxu0 }
 0x246   : > { %v1808_v52 = vadd.f32 %v3453_v35, %v4596_v47  ;;  %v1802_v62 = vpop.f32.mrb[75].mxu0 }
 0x247   : > { %v1803_v9 = vadd.f32 %v4596_v47, %v1802_v62  ;;  %3576 = vmatprep.mubr.f32.mxu1 %v1951_v63 }
 0x248   : > { %3577 = vmatmul.mubr.f32.gmra.mrb[88].mxu1 %v1952_v26  ;;  %v1954_v2 = vmax.f32 %v1808_v52, 0.0 }
 0x249   : > { %v1953_v18 = vmax.f32 %v1803_v9, 0.0  ;;  %v3456_v58 = vpop.f32.mrb[76].mxu0 }
 0x24a   : > { %v1818_v5 = vadd.f32 %v3456_v58, %v4596_v47  ;;  %v1812_v39 = vpop.f32.mrb[77].mxu0 }
 0x24b   : > { %v1813_v44 = vadd.f32 %v4596_v47, %v1812_v39  ;;  %3579 = vmatprep.mubr.f32.mxu1 %v1953_v18 }
 0x24c   : > { %3580 = vmatmul.mubr.f32.gmra.mrb[90].mxu1 %v1954_v2  ;;  %v1956_v4 = vmax.f32 %v1818_v5, 0.0 }
 0x24d   : > { %v1955_v38 = vmax.f32 %v1813_v44, 0.0  ;;  %v3459_v37 = vpop.f32.mrb[78].mxu0 }
 0x24e   : > { %v1828_v6 = vadd.f32 %v3459_v37, %v4596_v47  ;;  %v1822_v31 = vpop.f32.mrb[79].mxu0 }
 0x24f   : > { %v1823_v8 = vadd.f32 %v4596_v47, %v1822_v31  ;;  %3582 = vmatprep.mubr.f32.mxu1 %v1955_v38 }
 0x250   : > { %3583 = vmatmul.mubr.f32.gmra.mrb[92].mxu1 %v1956_v4  ;;  %v1958_v41 = vmax.f32 %v1828_v6, 0.0 }
 0x251   : > { %v1957_v11 = vmax.f32 %v1823_v8, 0.0  ;;  %v3462_v48 = vpop.f32.mrb[80].mxu0 }
 0x252   : > { %v1838_v51 = vadd.f32 %v3462_v48, %v4596_v47  ;;  %v1832_v21 = vpop.f32.mrb[81].mxu0 }
 0x253   : > { %v1833_v10 = vadd.f32 %v4596_v47, %v1832_v21  ;;  %3585 = vmatprep.mubr.f32.mxu1 %v1957_v11 }
 0x254   : > { %3586 = vmatmul.mubr.f32.gmra.mrb[94].mxu1 %v1958_v41  ;;  %v1960_v49 = vmax.f32 %v1838_v51, 0.0 }
 0x255   : > { %v1959_v15 = vmax.f32 %v1833_v10, 0.0  ;;  %v3465_v28 = vpop.f32.mrb[82].mxu0 }
 0x256   : > { %v1848_v14 = vadd.f32 %v3465_v28, %v4596_v47  ;;  %v1842_v24 = vpop.f32.mrb[83].mxu0 }
 0x257   : > { %v1843_v17 = vadd.f32 %v4596_v47, %v1842_v24  ;;  %3588 = vmatprep.mubr.f32.mxu1 %v1959_v15 }
 0x258   : > { %3589 = vmatmul.mubr.f32.gmra.mrb[96].mxu1 %v1960_v49  ;;  %v1962_v12 = vmax.f32 %v1848_v14, 0.0 }
 0x259   : > { %v1961_v42 = vmax.f32 %v1843_v17, 0.0  ;;  %v3468_v50 = vpop.f32.mrb[84].mxu0 }
 0x25a   : > { %v1858_v27 = vadd.f32 %v3468_v50, %v4596_v47  ;;  %v1852_v61 = vpop.f32.mrb[85].mxu0 }
 0x25b   : > { %v1853_v16 = vadd.f32 %v4596_v47, %v1852_v61  ;;  %3591 = vmatprep.mubr.f32.mxu1 %v1961_v42  ;;  %v4703_v61 = vld [vmem:[%s5000_s8] ss:$0 sm:$0xff] }
 0x25c   : > { %3592 = vmatmul.mubr.f32.gmra.mrb[98].mxu1 %v1962_v12  ;;  %v1964_v59 = vmax.f32 %v1858_v27, 0.0 }
 0x25d   : > { %v1963_v33 = vmax.f32 %v1853_v16, 0.0  ;;  %v3471_v25 = vpop.f32.mrb[86].mxu0 }
 0x25e   : > { %v1868_v20 = vadd.f32 %v3471_v25, %v4596_v47  ;;  %v1862_v36 = vpop.f32.mrb[87].mxu0 }
 0x25f   : > { %v1863_v54 = vadd.f32 %v4596_v47, %v1862_v36  ;;  %3594 = vmatprep.mubr.f32.mxu1 %v1963_v33 }
 0x260   : > { %3595 = vmatmul.mubr.f32.gmra.mrb[100].mxu1 %v1964_v59  ;;  %v1966_v23 = vmax.f32 %v1868_v20, 0.0 }
 0x261   : > { %v1965_v1 = vmax.f32 %v1863_v54, 0.0  ;;  %v3474_v45 = vpop.f32.mrb[88].mxu0 }
 0x262   : > { %v1878_v7 = vadd.f32 %v3474_v45, %v4596_v47  ;;  %v1872_v53 = vpop.f32.mrb[89].mxu0 }
 0x263   : > { %v1873_v57 = vadd.f32 %v4596_v47, %v1872_v53  ;;  %3597 = vmatprep.mubr.f32.mxu1 %v1965_v1 }
 0x264   : > { %3598 = vmatmul.mubr.f32.gmra.mrb[102].mxu1 %v1966_v23  ;;  %v1968_v30 = vmax.f32 %v1878_v7, 0.0 }
 0x265   : > { %v1967_v22 = vmax.f32 %v1873_v57, 0.0  ;;  %v3477_v13 = vpop.f32.mrb[90].mxu0 }
 0x266   : > { %v1888_v55 = vadd.f32 %v3477_v13, %v4596_v47  ;;  %v1882_v32 = vpop.f32.mrb[91].mxu0 }
 0x267   : > { %v1883_v19 = vadd.f32 %v4596_v47, %v1882_v32  ;;  %3600 = vmatprep.mubr.f32.mxu1 %v1967_v22 }
 0x268   : > { %3601 = vmatmul.mubr.f32.gmra.mrb[104].mxu1 %v1968_v30  ;;  %v1970_v29 = vmax.f32 %v1888_v55, 0.0 }
 0x269   : > { %v1969_v34 = vmax.f32 %v1883_v19, 0.0  ;;  %v3480_v43 = vpop.f32.mrb[92].mxu0 }
 0x26a   : > { %v1898_v56 = vadd.f32 %v3480_v43, %v4596_v47  ;;  %v1892_v3 = vpop.f32.mrb[93].mxu0 }
 0x26b   : > { %v1893_v0 = vadd.f32 %v4596_v47, %v1892_v3  ;;  %3603 = vmatprep.mubr.f32.mxu1 %v1969_v34 }
 0x26c   : > { %3604 = vmatmul.mubr.f32.gmra.mrb[106].mxu1 %v1970_v29  ;;  %v1972_v40 = vmax.f32 %v1898_v56, 0.0 }
 0x26d   : > { %v1971_v46 = vmax.f32 %v1893_v0, 0.0  ;;  %v3483_v60 = vpop.f32.mrb[94].mxu0 }
 0x26e   : > { %v1908_v63 = vadd.f32 %v3483_v60, %v4596_v47  ;;  %v1902_v35 = vpop.f32.mrb[95].mxu0 }
 0x26f   : > { %v1903_v26 = vadd.f32 %v4596_v47, %v1902_v35  ;;  %3606 = vmatprep.mubr.f32.mxu1 %v1971_v46 }
 0x270   : > { %3607 = vmatmul.mubr.f32.gmra.mrb[108].mxu1 %v1972_v40  ;;  %v1974_v62 = vmax.f32 %v1908_v63, 0.0 }
 0x271   : > { %v1973_v52 = vmax.f32 %v1903_v26, 0.0  ;;  %v4662_v9 = vpop.f32.mrb[96].mxu0 }
 0x272   : > { %v4664_v18 = vpop.f32.mrb[97].mxu0 }
 0x273   : > { %3609 = vmatprep.mubr.f32.mxu1 %v1973_v52 }
 0x274   : > { %3610 = vmatmul.mubr.f32.gmra.mrb[110].mxu1 %v1974_v62 }
 0x275   : > { %v4666_v58 = vpop.f32.mrb[98].mxu0 }
 0x276   : > { %v4668_v2 = vpop.f32.mrb[99].mxu0 }
 0x279   : > { %v4670_v5 = vpop.f32.mrb[100].mxu0 }
 0x27a   : > { %v4672_v39 = vpop.f32.mrb[101].mxu0 }
 0x27d   : > { %v4674_v44 = vpop.f32.mrb[102].mxu0 }
 0x27e   : > { %v4676_v47 = vpop.f32.mrb[103].mxu0 }
 0x281   : > { %v4678_v38 = vpop.f32.mrb[104].mxu0 }
 0x282   : > { %v4680_v37 = vpop.f32.mrb[105].mxu0 }
 0x285   : > { %v4682_v4 = vpop.f32.mrb[106].mxu0 }
 0x286   : > { %v4684_v6 = vpop.f32.mrb[107].mxu0 }
 0x289   : > { %v4686_v31 = vpop.f32.mrb[108].mxu0 }
 0x28a   : > { %v4688_v8 = vpop.f32.mrb[109].mxu0 }
 0x28d   : > { %v4690_v41 = vpop.f32.mrb[110].mxu0 }
 0x28e   : > { %v4692_v51 = vpop.f32.mrb[111].mxu0 }
 0x2cb   : > { %v3518_v11 = vpop.f32.mrb[48].mxu1 }
 0x2cc   : > { %v2064_v48 = vpop.f32.mrb[49].mxu1  ;;  %v2070_v25 = vadd.f32 %v3518_v11, %v4703_v61 }
 0x2cd   : > { %v2065_v59 = vadd.f32 %v4703_v61, %v2064_v48 }
 0x2ce   : > { %v2384_v45 = vmax.f32 %v2070_v25, 0.0 }
 0x2cf   : > { %v3521_v21 = vpop.f32.mrb[50].mxu1  ;;  %v2383_v53 = vmax.f32 %v2065_v59, 0.0 }
 0x2d0   : > { %v2074_v10 = vpop.f32.mrb[51].mxu1  ;;  %v2080_v23 = vadd.f32 %v3521_v21, %v4703_v61 }
 0x2d1   : > { %v2075_v57 = vadd.f32 %v4703_v61, %v2074_v10 }
 0x2d2   : > { %v2386_v43 = vmax.f32 %v2080_v23, 0.0 }
 0x2d3   : > { %v3524_v15 = vpop.f32.mrb[52].mxu1  ;;  %v2385_v3 = vmax.f32 %v2075_v57, 0.0 }
 0x2d4   : > { %v2084_v28 = vpop.f32.mrb[53].mxu1  ;;  %v2090_v29 = vadd.f32 %v3524_v15, %v4703_v61 }
 0x2d5   : > { %v2085_v0 = vadd.f32 %v4703_v61, %v2084_v28 }
 0x2d6   : > { %v2388_v62 = vmax.f32 %v2090_v29, 0.0 }
 0x2d7   : > { %v3527_v49 = vpop.f32.mrb[54].mxu1  ;;  %v2387_v21 = vmax.f32 %v2085_v0, 0.0 }
 0x2d8   : > { %v2094_v14 = vpop.f32.mrb[55].mxu1  ;;  %v2100_v11 = vadd.f32 %v3527_v49, %v4703_v61 }
 0x2d9   : > { %v2095_v10 = vadd.f32 %v4703_v61, %v2094_v14 }
 0x2db   : > { %v3530_v24 = vpop.f32.mrb[56].mxu1  ;;  %v2389_v49 = vmax.f32 %v2095_v10, 0.0 }
 0x2dc   : > { %v2104_v17 = vpop.f32.mrb[57].mxu1 }
 0x2df   : > { %v3533_v42 = vpop.f32.mrb[58].mxu1 }
 0x2e0   : > { %v4694_v50 = vpop.f32.mrb[59].mxu1 }
 0x2e3   : > { %v4696_v12 = vpop.f32.mrb[60].mxu1 }
 0x2e4   : > { %v4698_v27 = vpop.f32.mrb[61].mxu1 }
 0x2e7   : > { %v4705_v16 = vpop.f32.mrb[62].mxu1 }
 0x2e8   : > { %v4707_v33 = vpop.f32.mrb[63].mxu1 }
 0x2eb   : > { %v3542_v20 = vpop.f32.mrb[64].mxu1 }
 0x2ec   : > { %v2150_v36 = vadd.f32 %v3542_v20, %v4703_v61  ;;  %v2144_v54 = vpop.f32.mrb[65].mxu1 }
 0x2ed   : > { %v2145_v1 = vadd.f32 %v4703_v61, %v2144_v54 }
 0x2ee   : > { %v2400_v7 = vmax.f32 %v2150_v36, 0.0 }
 0x2ef   : > { %v2399_v22 = vmax.f32 %v2145_v1, 0.0  ;;  %v3545_v13 = vpop.f32.mrb[66].mxu1  ;;  %v2390_v1 = vmax.f32 %v2100_v11, 0.0 }
 0x2f0   : > { %v4715_v30 = vadd.f32 %v2400_v7, %v2384_v45  ;;  %v2160_v55 = vadd.f32 %v3545_v13, %v4703_v61  ;;  %v2154_v32 = vpop.f32.mrb[67].mxu1  ;;  %v2110_v45 = vadd.f32 %v3530_v24, %v4703_v61  ;;  %v2105_v7 = vadd.f32 %v4703_v61, %v2104_v17 }
 0x2f1   : > { %v4718_v19 = vadd.f32 %v2399_v22, %v2383_v53  ;;  %v2155_v34 = vadd.f32 %v4703_v61, %v2154_v32 }
 0x2f2   : > { %v2402_v56 = vmax.f32 %v2160_v55, 0.0  ;;  %v2391_v24 = vmax.f32 %v2105_v7, 0.0 }
 0x2f3   : > { %v2401_v46 = vmax.f32 %v2155_v34, 0.0  ;;  %v3548_v60 = vpop.f32.mrb[68].mxu1  ;;  %v2392_v34 = vmax.f32 %v2110_v45, 0.0 }
 0x2f4   : > { %v4723_v40 = vadd.f32 %v2402_v56, %v2386_v43  ;;  %v2170_v63 = vadd.f32 %v3548_v60, %v4703_v61  ;;  %v2164_v35 = vpop.f32.mrb[69].mxu1  ;;  %v2120_v43 = vadd.f32 %v3533_v42, %v4703_v61  ;;  %v2115_v56 = vadd.f32 %v4703_v61, %v4694_v50 }
 0x2f5   : > { %v4726_v26 = vadd.f32 %v2401_v46, %v2385_v3  ;;  %v2165_v52 = vadd.f32 %v4703_v61, %v2164_v35  ;;  %v2130_v42 = vadd.f32 %v4696_v12, %v4703_v61  ;;  %v2125_v50 = vadd.f32 %v4703_v61, %v4698_v27 }
 0x2f6   : > { %v2404_v48 = vmax.f32 %v2170_v63, 0.0  ;;  %v2393_v11 = vmax.f32 %v2115_v56, 0.0  ;;  %v2140_v12 = vadd.f32 %v4705_v16, %v4703_v61  ;;  %v2135_v27 = vadd.f32 %v4703_v61, %v4707_v33 }
 0x2f7   : > { %v2403_v15 = vmax.f32 %v2165_v52, 0.0  ;;  %v3551_v28 = vpop.f32.mrb[70].mxu1  ;;  %v2394_v52 = vmax.f32 %v2120_v43, 0.0  ;;  %v2395_v45 = vmax.f32 %v2125_v50, 0.0 }
 0x2f8   : > { %v4731_v25 = vadd.f32 %v2404_v48, %v2388_v62  ;;  %v2180_v59 = vadd.f32 %v3551_v28, %v4703_v61  ;;  %v2174_v20 = vpop.f32.mrb[71].mxu1  ;;  %v2397_v43 = vmax.f32 %v2135_v27, 0.0 }
 0x2f9   : > { %v4734_v36 = vadd.f32 %v2403_v15, %v2387_v21  ;;  %v2175_v54 = vadd.f32 %v4703_v61, %v2174_v20 }
 0x2fa   : > { %v2406_v23 = vmax.f32 %v2180_v59, 0.0 }
 0x2fb   : > { %v2405_v53 = vmax.f32 %v2175_v54, 0.0  ;;  %v3554_v14 = vpop.f32.mrb[72].mxu1  ;;  %v2396_v54 = vmax.f32 %v2130_v42, 0.0 }
 0x2fc   : > { %v4739_v57 = vadd.f32 %v2406_v23, %v2390_v1  ;;  %v2190_v22 = vadd.f32 %v3554_v14, %v4703_v61  ;;  %v2184_v13 = vpop.f32.mrb[73].mxu1 }
 0x2fd   : > { %v4742_v55 = vadd.f32 %v2405_v53, %v2389_v49  ;;  %v2185_v32 = vadd.f32 %v4703_v61, %v2184_v13 }
 0x2fe   : > { %v2408_v29 = vmax.f32 %v2190_v22, 0.0 }
 0x2ff   : > { %v2407_v17 = vmax.f32 %v2185_v32, 0.0  ;;  %v3557_v3 = vpop.f32.mrb[74].mxu1  ;;  %v2398_v32 = vmax.f32 %v2140_v12, 0.0 }
 0x300   : > { %v4748_v0 = vadd.f32 %v2408_v29, %v2392_v34  ;;  %v2200_v46 = vadd.f32 %v3557_v3, %v4703_v61  ;;  %v2194_v60 = vpop.f32.mrb[75].mxu1 }
 0x301   : > { %v4751_v63 = vadd.f32 %v2407_v17, %v2391_v24  ;;  %v2195_v35 = vadd.f32 %v4703_v61, %v2194_v60 }
 0x302   : > { %v2410_v62 = vmax.f32 %v2200_v46, 0.0 }
 0x303   : > { %v2409_v48 = vmax.f32 %v2195_v35, 0.0  ;;  %v3560_v21 = vpop.f32.mrb[76].mxu1 }
 0x304   : > { %v4758_v10 = vadd.f32 %v2410_v62, %v2394_v52  ;;  %v2210_v15 = vadd.f32 %v3560_v21, %v4703_v61  ;;  %v2204_v28 = vpop.f32.mrb[77].mxu1 }
 0x305   : > { %v4761_v59 = vadd.f32 %v2409_v48, %v2393_v11  ;;  %v2205_v20 = vadd.f32 %v4703_v61, %v2204_v28 }
 0x306   : > { %v2412_v1 = vmax.f32 %v2210_v15, 0.0 }
 0x307   : > { %v2411_v23 = vmax.f32 %v2205_v20, 0.0  ;;  %v3563_v49 = vpop.f32.mrb[78].mxu1 }
 0x308   : > { %v4768_v7 = vadd.f32 %v2412_v1, %v2396_v54  ;;  %v2220_v53 = vadd.f32 %v3563_v49, %v4703_v61  ;;  %v2214_v14 = vpop.f32.mrb[79].mxu1 }
 0x309   : > { %v4771_v22 = vadd.f32 %v2411_v23, %v2395_v45  ;;  %v2215_v13 = vadd.f32 %v4703_v61, %v2214_v14 }
 0x30a   : > { %v2414_v34 = vmax.f32 %v2220_v53, 0.0 }
 0x30b   : > { %v2413_v16 = vmax.f32 %v2215_v13, 0.0  ;;  %v3566_v29 = vpop.f32.mrb[80].mxu1 }
 0x30c   : > { %v4774_v24 = vadd.f32 %v2414_v34, %v2398_v32  ;;  %v2230_v33 = vadd.f32 %v3566_v29, %v4703_v61  ;;  %v2224_v56 = vpop.f32.mrb[81].mxu1 }
 0x30d   : > { %v4777_v17 = vadd.f32 %v2413_v16, %v2397_v43  ;;  %v2225_v3 = vadd.f32 %v4703_v61, %v2224_v56 }
 0x30e   : > { %v2416_v46 = vmax.f32 %v2230_v33, 0.0 }
 0x30f   : > { %v2415_v60 = vmax.f32 %v2225_v3, 0.0  ;;  %v3569_v35 = vpop.f32.mrb[82].mxu1 }
 0x310   : > { %v4781_v52 = vadd.f32 %v4715_v30, %v2416_v46  ;;  %v2240_v42 = vadd.f32 %v3569_v35, %v4703_v61  ;;  %v2234_v62 = vpop.f32.mrb[83].mxu1 }
 0x311   : > { %v4785_v11 = vadd.f32 %v4718_v19, %v2415_v60  ;;  %v2235_v50 = vadd.f32 %v4703_v61, %v2234_v62 }
 0x312   : > { %v2418_v48 = vmax.f32 %v2240_v42, 0.0 }
 0x313   : > { %v2417_v21 = vmax.f32 %v2235_v50, 0.0  ;;  %v3572_v15 = vpop.f32.mrb[84].mxu1 }
 0x314   : > { %v4789_v28 = vadd.f32 %v4723_v40, %v2418_v48  ;;  %v2250_v20 = vadd.f32 %v3572_v15, %v4703_v61  ;;  %v2244_v54 = vpop.f32.mrb[85].mxu1 }
 0x315   : > { %v4793_v30 = vadd.f32 %v4726_v26, %v2417_v21  ;;  %v2245_v12 = vadd.f32 %v4703_v61, %v2244_v54 }
 0x316   : > { %v2420_v1 = vmax.f32 %v2250_v20, 0.0 }
 0x317   : > { %v2419_v45 = vmax.f32 %v2245_v12, 0.0  ;;  %v3575_v19 = vpop.f32.mrb[86].mxu1 }
 0x318   : > { %v4797_v27 = vadd.f32 %v4731_v25, %v2420_v1  ;;  %v2260_v23 = vadd.f32 %v3575_v19, %v4703_v61  ;;  %v2254_v49 = vpop.f32.mrb[87].mxu1 }
 0x319   : > { %v4801_v40 = vadd.f32 %v4734_v36, %v2419_v45  ;;  %v2255_v53 = vadd.f32 %v4703_v61, %v2254_v49 }
 0x31a   : > { %v2422_v14 = vmax.f32 %v2260_v23, 0.0 }
 0x31b   : > { %v2421_v13 = vmax.f32 %v2255_v53, 0.0  ;;  %v3578_v26 = vpop.f32.mrb[88].mxu1 }
 0x31c   : > { %v4805_v32 = vadd.f32 %v4739_v57, %v2422_v14  ;;  %v2270_v34 = vadd.f32 %v3578_v26, %v4703_v61  ;;  %v2264_v43 = vpop.f32.mrb[89].mxu1 }
 0x31d   : > { %v4809_v25 = vadd.f32 %v4742_v55, %v2421_v13  ;;  %v2265_v16 = vadd.f32 %v4703_v61, %v2264_v43 }
 0x31e   : > { %v2424_v29 = vmax.f32 %v2270_v34, 0.0 }
 0x31f   : > { %v2423_v33 = vmax.f32 %v2265_v16, 0.0  ;;  %v3581_v36 = vpop.f32.mrb[90].mxu1 }
 0x320   : > { %v4813_v56 = vadd.f32 %v4748_v0, %v2424_v29  ;;  %v2280_v3 = vadd.f32 %v3581_v36, %v4703_v61  ;;  %v2274_v46 = vpop.f32.mrb[91].mxu1 }
 0x321   : > { %v4817_v57 = vadd.f32 %v4751_v63, %v2423_v33  ;;  %v2275_v60 = vadd.f32 %v4703_v61, %v2274_v46 }
 0x322   : > { %v2426_v35 = vmax.f32 %v2280_v3, 0.0 }
 0x323   : > { %v2425_v42 = vmax.f32 %v2275_v60, 0.0  ;;  %v3584_v55 = vpop.f32.mrb[92].mxu1 }
 0x324   : > { %v4821_v62 = vadd.f32 %v4758_v10, %v2426_v35  ;;  %v2290_v50 = vadd.f32 %v3584_v55, %v4703_v61  ;;  %v2284_v48 = vpop.f32.mrb[93].mxu1 }
 0x325   : > { %v4825_v0 = vadd.f32 %v4761_v59, %v2425_v42  ;;  %v2285_v21 = vadd.f32 %v4703_v61, %v2284_v48 }
 0x326   : > { %v2428_v15 = vmax.f32 %v2290_v50, 0.0 }
 0x327   : > { %v2427_v20 = vmax.f32 %v2285_v21, 0.0  ;;  %v3587_v63 = vpop.f32.mrb[94].mxu1 }
 0x328   : > { %v4829_v54 = vadd.f32 %v4768_v7, %v2428_v15  ;;  %v2300_v12 = vadd.f32 %v3587_v63, %v4703_v61  ;;  %v2294_v1 = vpop.f32.mrb[95].mxu1 }
 0x329   : > { %v4833_v10 = vadd.f32 %v4771_v22, %v2427_v20  ;;  %v2295_v45 = vadd.f32 %v4703_v61, %v2294_v1  ;;  %v4847_v22 = vld [vmem:[%s5002_s10] ss:$0 sm:$0xff] }
 0x32a   : > { %v2430_v19 = vmax.f32 %v2300_v12, 0.0  ;;  %v2591_v33 = vadd.f32 %v4662_v9, %v4847_v22  ;;  %v2586_v36 = vadd.f32 %v4847_v22, %v4664_v18  ;;  %v2601_v9 = vadd.f32 %v4666_v58, %v4847_v22 }
 0x32b   : > { %v2429_v23 = vmax.f32 %v2295_v45, 0.0  ;;  %v3590_v59 = vpop.f32.mrb[96].mxu1 }
 0x32c   : > { %v4837_v49 = vadd.f32 %v4774_v24, %v2430_v19  ;;  %v2310_v53 = vadd.f32 %v3590_v59, %v4703_v61  ;;  %v2304_v14 = vpop.f32.mrb[97].mxu1 }
 0x32d   : > { %v4841_v7 = vadd.f32 %v4777_v17, %v2429_v23  ;;  %v2305_v13 = vadd.f32 %v4703_v61, %v2304_v14 }
 0x32e   : > { %v2432_v26 = vmax.f32 %v2310_v53, 0.0 }
 0x32f   : > { %v2431_v34 = vmax.f32 %v2305_v13, 0.0  ;;  %v3593_v43 = vpop.f32.mrb[98].mxu1  ;;  %v2606_v13 = vadd.f32 %v4847_v22, %v4672_v39 }
 0x330   : > { %v2452_v16 = vadd.f32 %v4781_v52, %v2432_v26  ;;  %v2320_v24 = vadd.f32 %v3593_v43, %v4703_v61  ;;  %v2314_v29 = vpop.f32.mrb[99].mxu1 }
 0x331   : > { %v2315_v17 = vadd.f32 %v4703_v61, %v2314_v29  ;;  %v2449_v3 = vadd.f32 %v4785_v11, %v2431_v34  ;;  %v2596_v11 = vadd.f32 %v4847_v22, %v4668_v2 }
 0x332   : > { %v2496_v46 = vmul.f32 0.25, %v2452_v16  ;;  %v2434_v60 = vmax.f32 %v2320_v24, 0.0 }
 0x333   : > { %v2433_v35 = vmax.f32 %v2315_v17, 0.0  ;;  %v3596_v42 = vpop.f32.mrb[100].mxu1  ;;  %v2495_v55 = vmul.f32 0.25, %v2449_v3 }
 0x334   : > { %v2458_v52 = vadd.f32 %v4789_v28, %v2434_v60  ;;  %v2330_v50 = vadd.f32 %v3596_v42, %v4703_v61  ;;  %v2324_v48 = vpop.f32.mrb[101].mxu1  ;;  %v2665_v21 = vadd.f32 %v2591_v33, %v2496_v46  ;;  %v2616_v46 = vadd.f32 %v4847_v22, %v4676_v47 }
 0x335   : > { %v2455_v15 = vadd.f32 %v4793_v30, %v2433_v35  ;;  %v2325_v18 = vadd.f32 %v4703_v61, %v2324_v48  ;;  %v2664_v20 = vadd.f32 %v2586_v36, %v2495_v55  ;;  %v2611_v30 = vadd.f32 %v4670_v5, %v4847_v22 }
 0x336   : > { %v2498_v63 = vmul.f32 0.25, %v2458_v52  ;;  %v2436_v12 = vmax.f32 %v2330_v50, 0.0  ;;  %v2681_v29 = vmax.f32 %v2665_v21, 0.0 }
 0x337   : > { %v2497_v1 = vmul.f32 0.25, %v2455_v15  ;;  %v2435_v45 = vmax.f32 %v2325_v18, 0.0  ;;  %v3599_v28 = vpop.f32.mrb[102].mxu1  ;;  %v2680_v19 = vmax.f32 %v2664_v20, 0.0  ;;  %v2626_v18 = vadd.f32 %v4847_v22, %v4680_v37 }
 0x338   : > { %v2464_v23 = vadd.f32 %v4797_v27, %v2436_v12  ;;  %v2340_v59 = vadd.f32 %v3599_v28, %v4703_v61  ;;  %v2334_v58 = vpop.f32.mrb[103].mxu1  ;;  %v2667_v53 = vadd.f32 %v2601_v9, %v2498_v63 }
 0x339   : > { %v2461_v14 = vadd.f32 %v4801_v40, %v2435_v45  ;;  %v2335_v2 = vadd.f32 %v4703_v61, %v2334_v58  ;;  %2696 = vxpose.xlu0.b32.start [1/16] %v2680_v19, 128  ;;  %v2666_v26 = vadd.f32 %v2596_v11, %v2497_v1  ;;  %v2621_v40 = vadd.f32 %v4674_v44, %v4847_v22 }
 0x33a   : > { %v2500_v34 = vmul.f32 0.25, %v2464_v23  ;;  %v2438_v43 = vmax.f32 %v2340_v59, 0.0  ;;  %v2683_v45 = vmax.f32 %v2667_v53, 0.0  ;;  %v2636_v58 = vadd.f32 %v4847_v22, %v4684_v6 }
 0x33b   : > { %v2499_v16 = vmul.f32 0.25, %v2461_v14  ;;  %v2437_v27 = vmax.f32 %v2335_v2, 0.0  ;;  %v3602_v24 = vpop.f32.mrb[104].mxu1  ;;  %v2682_v50 = vmax.f32 %v2666_v26, 0.0 }
 0x33c   : > { %v2470_v33 = vadd.f32 %v4805_v32, %v2438_v43  ;;  %v2350_v5 = vadd.f32 %v3602_v24, %v4703_v61  ;;  %v2344_v17 = vpop.f32.mrb[105].mxu1  ;;  %v4877_v36 = vadd.f32 %v2611_v30, %v2500_v34  ;;  %v2646_v24 = vadd.f32 %v4847_v22, %v4688_v8 }
 0x33d   : > { %v2467_v3 = vadd.f32 %v4809_v25, %v2437_v27  ;;  %v2345_v39 = vadd.f32 %v4703_v61, %v2344_v17  ;;  %2697 = vxpose.xlu0.b32.cont [2/16] %v2681_v29, 128  ;;  %v2668_v60 = vadd.f32 %v2606_v13, %v2499_v16  ;;  %v2631_v25 = vadd.f32 %v4678_v38, %v4847_v22 }
 0x33e   : > { %v2502_v35 = vmul.f32 0.25, %v2470_v33  ;;  %v2440_v42 = vmax.f32 %v2350_v5, 0.0 }
 0x33f   : > { %v2501_v32 = vmul.f32 0.25, %v2467_v3  ;;  %v2439_v55 = vmax.f32 %v2345_v39, 0.0  ;;  %v3605_v52 = vpop.f32.mrb[106].mxu1  ;;  %v2684_v26 = vmax.f32 %v2668_v60, 0.0 }
 0x340   : > { %v2476_v48 = vadd.f32 %v4813_v56, %v2440_v42  ;;  %v2360_v44 = vadd.f32 %v3605_v52, %v4703_v61  ;;  %v2354_v9 = vpop.f32.mrb[107].mxu1  ;;  %v2671_v21 = vadd.f32 %v2621_v40, %v2502_v35  ;;  %v2685_v40 = vmax.f32 %v4877_v36, 0.0 }
 0x341   : > { %v2473_v15 = vadd.f32 %v4817_v57, %v2439_v55  ;;  %v2355_v47 = vadd.f32 %v4703_v61, %v2354_v9  ;;  %2698 = vxpose.xlu0.b32.cont [3/16] %v2682_v50, 128  ;;  %v2670_v11 = vadd.f32 %v2616_v46, %v2501_v32  ;;  %v2641_v57 = vadd.f32 %v4682_v4, %v4847_v22 }
 0x342   : > { %v2504_v20 = vmul.f32 0.25, %v2476_v48  ;;  %v2442_v63 = vmax.f32 %v2360_v44, 0.0  ;;  %v2687_v36 = vmax.f32 %v2671_v21, 0.0 }
 0x343   : > { %v2503_v12 = vmul.f32 0.25, %v2473_v15  ;;  %v2441_v56 = vmax.f32 %v2355_v47, 0.0  ;;  %v3608_v1 = vpop.f32.mrb[108].mxu1  ;;  %v2686_v35 = vmax.f32 %v2670_v11, 0.0 }
 0x344   : > { %v2482_v28 = vadd.f32 %v4821_v62, %v2442_v63  ;;  %v2370_v38 = vadd.f32 %v3608_v1, %v4703_v61  ;;  %v2364_v19 = vpop.f32.mrb[109].mxu1  ;;  %v2673_v23 = vadd.f32 %v2631_v25, %v2504_v20 }
 0x345   : > { %v2479_v59 = vadd.f32 %v4825_v0, %v2441_v56  ;;  %v2365_v37 = vadd.f32 %v4703_v61, %v2364_v19  ;;  %2699 = vxpose.xlu0.b32.cont [4/16] %v2683_v45, 128  ;;  %v2672_v30 = vadd.f32 %v2626_v18, %v2503_v12  ;;  %v2651_v0 = vadd.f32 %v4686_v31, %v4847_v22 }
 0x346   : > { %v2506_v14 = vmul.f32 0.25, %v2482_v28  ;;  %v2444_v53 = vmax.f32 %v2370_v38, 0.0  ;;  %v2661_v31 = vadd.f32 %v4690_v41, %v4847_v22  ;;  %v2689_v41 = vmax.f32 %v2673_v23, 0.0 }
 0x347   : > { %v2505_v2 = vmul.f32 0.25, %v2479_v59  ;;  %v2443_v62 = vmax.f32 %v2365_v37, 0.0  ;;  %v3611_v13 = vpop.f32.mrb[110].mxu1 }
 0x348   : > { %v2488_v34 = vadd.f32 %v4829_v54, %v2444_v53  ;;  %v2380_v4 = vadd.f32 %v3611_v13, %v4703_v61  ;;  %v2374_v43 = vpop.f32.mrb[111].mxu1  ;;  %v2675_v16 = vadd.f32 %v2641_v57, %v2506_v14 }
 0x349   : > { %v2485_v27 = vadd.f32 %v4833_v10, %v2443_v62  ;;  %v2375_v6 = vadd.f32 %v4703_v61, %v2374_v43  ;;  %2700 = vxpose.xlu0.b32.cont [5/16] %v2684_v26, 128  ;;  %v2674_v29 = vadd.f32 %v2636_v58, %v2505_v2  ;;  %v2656_v61 = vadd.f32 %v4847_v22, %v4692_v51 }
 0x34a   : > { %v2508_v33 = vmul.f32 0.25, %v2488_v34  ;;  %v2446_v5 = vmax.f32 %v2380_v4, 0.0  ;;  %v2691_v55 = vmax.f32 %v2675_v16, 0.0 }
 0x34b   : > { %v2507_v17 = vmul.f32 0.25, %v2485_v27  ;;  %v2445_v54 = vmax.f32 %v2375_v6, 0.0 }
 0x34c   : > { %v2494_v3 = vadd.f32 %v4837_v49, %v2446_v5  ;;  %v2677_v39 = vadd.f32 %v2651_v0, %v2508_v33  ;;  %v2688_v49 = vmax.f32 %v2672_v30, 0.0 }
 0x34d   : > { %v2491_v10 = vadd.f32 %v4841_v7, %v2445_v54  ;;  %2701 = vxpose.xlu0.b32.cont [6/16] %v2685_v40, 128  ;;  %v2676_v8 = vadd.f32 %v2646_v24, %v2507_v17  ;;  %v2690_v7 = vmax.f32 %v2674_v29, 0.0 }
 0x34e   : > { %v2510_v46 = vmul.f32 0.25, %v2494_v3  ;;  %v2693_v22 = vmax.f32 %v2677_v39, 0.0 }
 0x34f   : > { %v2509_v60 = vmul.f32 0.25, %v2491_v10  ;;  %v2692_v51 = vmax.f32 %v2676_v8, 0.0 }
 0x350   : > { %v2679_v42 = vadd.f32 %v2661_v31, %v2510_v46 }
 0x351   : > { %2702 = vxpose.xlu0.b32.cont [7/16] %v2686_v35, 128  ;;  %v2678_v32 = vadd.f32 %v2656_v61, %v2509_v60 }
 0x352   : > { %v2695_v50 = vmax.f32 %v2679_v42, 0.0 }
 0x353   : > { %v2694_v52 = vmax.f32 %v2678_v32, 0.0 }
 0x355   : > { %2703 = vxpose.xlu0.b32.cont [8/16] %v2687_v36, 128 }
 0x359   : > { %2704 = vxpose.xlu0.b32.cont [9/16] %v2688_v49, 128 }
 0x35d   : > { %2705 = vxpose.xlu0.b32.cont [10/16] %v2689_v41, 128 }
 0x361   : > { %2706 = vxpose.xlu0.b32.cont [11/16] %v2690_v7, 128 }
 0x365   : > { %2707 = vxpose.xlu0.b32.cont [12/16] %v2691_v55, 128 }
 0x369   : > { %2708 = vxpose.xlu0.b32.cont [13/16] %v2692_v51, 128 }
 0x36d   : > { %2709 = vxpose.xlu0.b32.cont [14/16] %v2693_v22, 128 }
 0x371   : > { %2710 = vxpose.xlu0.b32.cont [15/16] %v2694_v52, 128 }
 0x375   : > { %2711 = vxpose.xlu0.b32.end [16/16] %v2695_v50, 128 }
 0x3b9   : > { %v2712_v48 = vpop.trf.xlu0 }
 0x3ba   : > { %2728 = vst [vmem:[%s4917_s23] sm:$0xff] %v2712_v48 }
 0x3bd   : > { %v2713_v44 = vpop.trf.xlu0 }
 0x3be   : > { %2729 = vst [vmem:[%s4917_s23 + $0x8] sm:$0xff] %v2713_v44 }
 0x3c1   : > { %v2714_v9 = vpop.trf.xlu0 }
 0x3c2   : > { %2730 = vst [vmem:[%s4917_s23 + $0x10] sm:$0xff] %v2714_v9 }
 0x3c5   : > { %v2715_v25 = vpop.trf.xlu0 }
 0x3c6   : > { %2731 = vst [vmem:[%s4917_s23 + $0x18] sm:$0xff] %v2715_v25 }
 0x3c9   : > { %v2716_v21 = vpop.trf.xlu0 }
 0x3ca   : > { %2732 = vst [vmem:[%s4917_s23 + $0x20] sm:$0xff] %v2716_v21 }
 0x3cd   : > { %v2717_v15 = vpop.trf.xlu0 }
 0x3ce   : > { %2733 = vst [vmem:[%s4917_s23 + $0x28] sm:$0xff] %v2717_v15 }
 0x3d1   : > { %v2718_v47 = vpop.trf.xlu0 }
 0x3d2   : > { %2734 = vst [vmem:[%s4917_s23 + $0x30] sm:$0xff] %v2718_v47 }
 0x3d5   : > { %v2719_v18 = vpop.trf.xlu0 }
 0x3d6   : > { %2735 = vst [vmem:[%s4917_s23 + $0x38] sm:$0xff] %v2719_v18 }
 0x3d9   : > { %v2720_v11 = vpop.trf.xlu0 }
 0x3da   : > { %2736 = vst [vmem:[%s4917_s23 + $0x40] sm:$0xff] %v2720_v11 }
 0x3dd   : > { %v2721_v20 = vpop.trf.xlu0 }
 0x3de   : > { %2737 = vst [vmem:[%s4917_s23 + $0x48] sm:$0xff] %v2721_v20 }
 0x3e1   : > { %v2722_v63 = vpop.trf.xlu0 }
 0x3e2   : > { %2738 = vst [vmem:[%s4917_s23 + $0x50] sm:$0xff] %v2722_v63 }
 0x3e5   : > { %v2723_v12 = vpop.trf.xlu0 }
 0x3e6   : > { %2739 = vst [vmem:[%s4917_s23 + $0x58] sm:$0xff] %v2723_v12 }
 0x3e9   : > { %v2724_v56 = vpop.trf.xlu0 }
 0x3ea   : > { %2740 = vst [vmem:[%s4917_s23 + $0x60] sm:$0xff] %v2724_v56 }
 0x3ed   : > { %v2725_v1 = vpop.trf.xlu0 }
 0x3ee   : > { %2741 = vst [vmem:[%s4917_s23 + $0x68] sm:$0xff] %v2725_v1 }
 0x3f1   : > { %v2726_v45 = vpop.trf.xlu0 }
 0x3f2   : > { %2742 = vst [vmem:[%s4917_s23 + $0x70] sm:$0xff] %v2726_v45 }
 0x3f5   : > { %v2727_v28 = vpop.trf.xlu0 }
 0x3f6   : > { %2743 = vst [vmem:[%s4917_s23 + $0x78] sm:$0xff] %v2727_v28 }
 0x3f7   : > { %3790 = shalt.err (!%p3787_p5)
}
 0x3f8   : > { %s3791_s15 = scalar_lea.hbm %s4939_s13, 2048  ;;  %s3795_s14 = scalar_lea.hbm %s5003_s11, 4096 }
 0x3f9   : > { %p3792_p6 = scmp.ne.s32.totalorder %s4939_s13, %s3791_s15  ;;  %p3796_p10 = scmp.lt.u32.totalorder %s4939_s13, %s5003_s11 }
 0x3fa   : > { %p3797_p11 = scmp.lt.u32.totalorder %s3795_s14, %s3791_s15  ;;  %p3799_p13 = scmp.lt.u32.totalorder %s3791_s15, %s4939_s13 }
 0x3fb   : > { %p3793_p7 = pnand %p3792_p6, %p3960_p4 }
 0x3fc   : > { %p3798_p12 = por %p3797_p11, %p3796_p10 }
 0x3fd   : > { %p3794_p9 = pneg %p3793_p7 }
 0x3fe   : > { %p3800_p0 = por %p3799_p13, %p3798_p12 }
 0x400   : > { %p3801_p1 = pnand %p3800_p0, %p3794_p9 }
 0x402   : > { %3804 = shalt.err (!%p3801_p1)
}
 0x403   : > { %s3858_s2 = smov 128   ;;  %s3859_s24 = smov 8  }
 0x404   : > { %3704 = dma.vmem_to_hbm [thread:$0]  (%p3960_p4), %s4941_s26, 2048, %s4939_s13, %s4946_s12, %s3858_s2, %s3858_s2, %s3859_s24  }
 0x405 PF: > { %p3710_p2 = scmp.ge.s32.totalorder %s3855_s22, 2  ;;  %s2774_s23 = sand.u32 1, %s3835_s17  }
 0x406   : > { %s2775_s15 = scalar_lea.sflag [#allocation3], %s2774_s23 }
 0x407   : > { %p3707_p3 = pnand %p3710_p2, %p3967_p8 }
 0x409   : > { %3830 = dma.done.wait (!%p3707_p3), %s2775_s15, 2048  }
 0x40a   : > { %3832 = vsyncadd (!%p3707_p3), %s2775_s15, 4294965248  ;;  %s24_s22 = sadd.s32 1, %s3855_s22   ;;  %s5012_s17 = smov %s3839_s18 }
 0x40b   : > { %p21_p5 = scmp.ge.s32.totalorder %s24_s22, 4   ;;  %s5013_s18 = smov %s3843_s19 }
 0x40c   : > { %s5014_s19 = smov %s3973_s30  ;;  %s5015_s20 = smov %s3851_s21 }
 0x40d   : > { %s5016_s21 = smov %s5018_s25  ;;  %23 = sbr.rel (!%p21_p5) target bundleno = 6 (0x6), region = 102 }
 0x414   :  { %2780 = vsyncpa [#allocation3], 1 }
 0x415   :  { %2782 = vsyncpa [#allocation3 + $0x1], 1 }

</bundles_post_ra>
